<compile_context>
chip_gen: v7x
topology: tpu7x:2x2x1
jax: 0.10.0
libtpu: 0.0.40
codegen_flags: <defaults>
</compile_context>

<pallas_src>
import math
import numpy as np
import jax
import jax.numpy as jnp
from jax.experimental import pallas as pl
from jax.experimental.pallas import tpu as pltpu  # noqa: F401  (kept per template)

# ---- small, module-consistent sizes ----
VOCAB = 64
D_MODEL = 32
NUM_HEADS = 4
D_K = D_MODEL // NUM_HEADS
D_FF = 64
NUM_LAYERS = 2
SEQ = 8
BATCH = 2
BS = BATCH * SEQ
BH = BATCH * NUM_HEADS
LN_EPS = 1e-5
LANE = 128

# ---- packed-slab row layout (all static offsets, multiples of 8) ----
W_EMBPOS_R = 0                                     # rows 0..79: [emb(64,32); pos_tiled(16,32)]
W_LAYER0_R = VOCAB + BS                            # 80
W_QKV_OFF = 0                                      # (32, 96)  [Wq*scale | Wk | Wv]
W_WO_OFF = D_MODEL                                 # (32, 32)
W_W1_OFF = 2 * D_MODEL                             # (32, 64)
W_W2_OFF = 3 * D_MODEL                             # (64, 32)
W_ROWS_PER_LAYER = 3 * D_MODEL + D_FF              # 160
W_FC_R = W_LAYER0_R + NUM_LAYERS * W_ROWS_PER_LAYER  # 400
W_TOTAL_R = W_FC_R + D_MODEL                       # 432

B_ROWS_PER_LAYER = 8                               # bqkv, bo, b1, b2, g1, be1, g2, be2
B_FC_R = NUM_LAYERS * B_ROWS_PER_LAYER             # 16
B_TOTAL_R = 24


def _layernorm(x, gamma, beta):
    mean = jnp.mean(x, axis=-1, keepdims=True)
    var = jnp.mean((x - mean) ** 2, axis=-1, keepdims=True)
    return (x - mean) * jax.lax.rsqrt(var + LN_EPS) * gamma + beta


# ---------------- single fused Pallas kernel ----------------

def fused_forward_kernel(tok_ref, w_ref, b_ref, logits_ref, probs_ref):
    # ---- embedding gather + positional add fused into ONE one-hot matmul
    tok = tok_ref[...]                                                 # (BS, 1) int32
    lane = jax.lax.broadcasted_iota(jnp.int32, (BS, VOCAB + BS), 1)
    row = jax.lax.broadcasted_iota(jnp.int32, (BS, VOCAB + BS), 0)
    lhs = jnp.logical_or(lane == tok, lane == row + VOCAB).astype(jnp.float32)  # [one_hot | I]
    x = jnp.dot(lhs, w_ref[W_EMBPOS_R:W_EMBPOS_R + VOCAB + BS, 0:D_MODEL],
                preferred_element_type=jnp.float32)                    # (BS, D) = emb[tok] + pos
    # dropout = identity (eval)

    probs_pieces = []                  # 16 x (SEQ, SEQ) blocks, lane order (layer, batch, head)
    for l in range(NUM_LAYERS):        # static unroll over layers
        wb = W_LAYER0_R + l * W_ROWS_PER_LAYER
        bb = l * B_ROWS_PER_LAYER

        # fused QKV projection on the (B*S, D) slab (1/sqrt(d_k) folded into Wq/bq offline)
        qkv = jnp.dot(x, w_ref[wb + W_QKV_OFF:wb + W_QKV_OFF + D_MODEL, 0:3 * D_MODEL],
                      preferred_element_type=jnp.float32) + b_ref[bb:bb + 1, 0:3 * D_MODEL]

        def heads(off):
            # (B*S, 3D) -> (B*H, S, d_k), built with lane slices + major-dim stack only
            parts = [qkv[:, off + h * D_K: off + (h + 1) * D_K].reshape(BATCH, SEQ, D_K)
                     for h in range(NUM_HEADS)]
            return jnp.stack(parts, axis=1).reshape(BH, SEQ, D_K)

        q, k, v = heads(0), heads(D_MODEL), heads(2 * D_MODEL)

        # head-batched attention (batch = B*H = 8), last-dim contractions (no transpose)
        scores = jnp.einsum('nqd,nkd->nqk', q, k, preferred_element_type=jnp.float32)
        scores = scores - jnp.max(scores, axis=-1, keepdims=True)
        e = jnp.exp(scores)
        probs = e * pl.reciprocal(jnp.sum(e, axis=-1, keepdims=True), approx=False)
        probs_pieces.extend(probs[n] for n in range(BH))               # (S, S) each
        ctx = jnp.einsum('nqk,nkd->nqd', probs, v, preferred_element_type=jnp.float32)

        # merge heads back to (B*S, D) and do ONE output-projection matmul
        ctx4 = ctx.reshape(BATCH, NUM_HEADS, SEQ, D_K)
        ctx_flat = jnp.concatenate(
            [ctx4[:, h].reshape(BS, D_K) for h in range(NUM_HEADS)], axis=-1)   # (BS, D)
        attn = jnp.dot(ctx_flat, w_ref[wb + W_WO_OFF:wb + W_WO_OFF + D_MODEL, 0:D_MODEL],
                       preferred_element_type=jnp.float32) + b_ref[bb + 1:bb + 2, 0:D_MODEL]

        # add & norm, feed-forward, add & norm   (dropout = identity)
        x = _layernorm(x + attn,
                       b_ref[bb + 4:bb + 5, 0:D_MODEL], b_ref[bb + 5:bb + 6, 0:D_MODEL])
        h1 = jnp.maximum(
            jnp.dot(x, w_ref[wb + W_W1_OFF:wb + W_W1_OFF + D_MODEL, 0:D_FF],
                    preferred_element_type=jnp.float32) + b_ref[bb + 2:bb + 3, 0:D_FF], 0.0)
        ff = jnp.dot(h1, w_ref[wb + W_W2_OFF:wb + W_W2_OFF + D_FF, 0:D_MODEL],
                     preferred_element_type=jnp.float32) + b_ref[bb + 3:bb + 4, 0:D_MODEL]
        x = _layernorm(x + ff,
                       b_ref[bb + 6:bb + 7, 0:D_MODEL], b_ref[bb + 7:bb + 8, 0:D_MODEL])

    # ---- lane-dense outputs, each written exactly once (unmasked full-width stores)
    logits_ref[...] = jnp.dot(x, w_ref[W_FC_R:W_FC_R + D_MODEL, :],
                              preferred_element_type=jnp.float32) + b_ref[B_FC_R:B_FC_R + 1, :]
    probs_ref[...] = jnp.concatenate(probs_pieces, axis=-1)            # (SEQ, 128) = one vreg


# ---------------- wrappers ----------------

def pack_params(params):
    """One-time preprocessing: fuse QKV, fold 1/sqrt(d_k), pack everything into 2 slabs."""
    scale = 1.0 / math.sqrt(D_K)
    wslab = np.zeros((W_TOTAL_R, LANE), np.float32)
    bslab = np.zeros((B_TOTAL_R, LANE), np.float32)

    emb = np.asarray(params["embedding"], np.float32)
    pos = np.asarray(params["pos_encoding"], np.float32)[:SEQ, :]
    wslab[0:VOCAB, 0:D_MODEL] = emb
    wslab[VOCAB:VOCAB + BS, 0:D_MODEL] = np.tile(pos, (BATCH, 1))

    for l, lp in enumerate(params["layers"]):
        (Wq, Bq, Wk, Bk, Wv, Bv, Wo, Bo,
         G1, Be1, G2, Be2, W1, B1, W2, B2) = [np.asarray(t, np.float32) for t in lp]
        wb = W_LAYER0_R + l * W_ROWS_PER_LAYER
        wslab[wb + W_QKV_OFF:wb + W_QKV_OFF + D_MODEL, 0:3 * D_MODEL] = \
            np.concatenate([Wq * scale, Wk, Wv], axis=1)
        wslab[wb + W_WO_OFF:wb + W_WO_OFF + D_MODEL, 0:D_MODEL] = Wo
        wslab[wb + W_W1_OFF:wb + W_W1_OFF + D_MODEL, 0:D_FF] = W1
        wslab[wb + W_W2_OFF:wb + W_W2_OFF + D_FF, 0:D_MODEL] = W2
        bb = l * B_ROWS_PER_LAYER
        bslab[bb + 0, 0:3 * D_MODEL] = np.concatenate([Bq[0] * scale, Bk[0], Bv[0]])
        bslab[bb + 1, 0:D_MODEL] = Bo[0]
        bslab[bb + 2, 0:D_FF] = B1[0]
        bslab[bb + 3, 0:D_MODEL] = B2[0]
        bslab[bb + 4, 0:D_MODEL] = G1[0]
        bslab[bb + 5, 0:D_MODEL] = Be1[0]
        bslab[bb + 6, 0:D_MODEL] = G2[0]
        bslab[bb + 7, 0:D_MODEL] = Be2[0]

    wslab[W_FC_R:W_FC_R + D_MODEL, 0:VOCAB] = np.asarray(params["fc_w"], np.float32)
    bslab[B_FC_R, 0:VOCAB] = np.asarray(params["fc_b"], np.float32)[0]
    return dict(wslab=jnp.asarray(wslab), bslab=jnp.asarray(bslab))


@jax.jit
def model_forward(tokens, packed):
    tok_flat = tokens.reshape(BS, 1).astype(jnp.int32)
    logits_pad, probs_flat = pl.pallas_call(
        fused_forward_kernel,
        out_shape=(jax.ShapeDtypeStruct((BS, LANE), jnp.float32),
                   jax.ShapeDtypeStruct((SEQ, LANE), jnp.float32)),
        cost_estimate=pl.CostEstimate(flops=770_048, transcendentals=1_216,
                                      bytes_accessed=245_824),
    )(tok_flat, packed["wslab"], packed["bslab"])

    logits = logits_pad[:, :VOCAB].reshape(BATCH, SEQ, VOCAB)
    # decode lane-dense probs: lane = ((l*B + b)*H + h)*S + k, row = q
    p = probs_flat.reshape(SEQ, NUM_LAYERS, BATCH, NUM_HEADS, SEQ)
    p = jnp.transpose(p, (1, 2, 3, 0, 4))                              # (L, B, H, S, S)
    all_probs = [p[l] for l in range(NUM_LAYERS)]
    return logits, all_probs


# ---------------- pure-JAX reference (for correctness check) ----------------

def ref_block(x, lp):
    wq, bq, wk, bk, wv, bv, wo, bo, g1, be1, g2, be2, w1, b1, w2, b2 = lp
    B, S, D = x.shape
    q = (x @ wq + bq).reshape(B, S, NUM_HEADS, D_K).transpose(0, 2, 1, 3)
    k = (x @ wk + bk).reshape(B, S, NUM_HEADS, D_K).transpose(0, 2, 1, 3)
    v = (x @ wv + bv).reshape(B, S, NUM_HEADS, D_K).transpose(0, 2, 1, 3)
    scores = jnp.einsum("bhqd,bhkd->bhqk", q, k) / math.sqrt(D_K)
    probs = jax.nn.softmax(scores, axis=-1)
    ctx = jnp.einsum("bhqk,bhkd->bhqd", probs, v)
    ctx = ctx.transpose(0, 2, 1, 3).reshape(B, S, D)
    attn_out = ctx @ wo + bo
    x1 = _layernorm(x + attn_out, g1, be1)
    ff = jnp.maximum(x1 @ w1 + b1, 0.0) @ w2 + b2
    x2 = _layernorm(x1 + ff, g2, be2)
    return x2, probs


def ref_forward(tokens, params):
    S = tokens.shape[1]
    x = jnp.take(params["embedding"], tokens, axis=0) + params["pos_encoding"][:S, :]
    all_probs = []
    for lp in params["layers"]:
        x, probs = ref_block(x, lp)
        all_probs.append(probs)
    return x @ params["fc_w"] + params["fc_b"], all_probs


# ---------------- deterministic parameter init ----------------

def init_params(key):
    def nrm(k, shape, scale=0.05):
        return (scale * jax.random.normal(k, shape)).astype(jnp.float32)

    keys = jax.random.split(key, 4 + NUM_LAYERS)
    params = {
        "embedding": nrm(keys[0], (VOCAB, D_MODEL), 0.1),
        "pos_encoding": nrm(keys[1], (1000, D_MODEL), 0.02),
        "fc_w": nrm(keys[2], (D_MODEL, VOCAB)),
        "fc_b": nrm(keys[3], (1, VOCAB)),
        "layers": [],
    }
    for l in range(NUM_LAYERS):
        lk = jax.random.split(keys[4 + l], 12)
        layer = (
            nrm(lk[0], (D_MODEL, D_MODEL)), nrm(lk[1], (1, D_MODEL)),   # W_q, b_q
            nrm(lk[2], (D_MODEL, D_MODEL)), nrm(lk[3], (1, D_MODEL)),   # W_k, b_k
            nrm(lk[4], (D_MODEL, D_MODEL)), nrm(lk[5], (1, D_MODEL)),   # W_v, b_v
            nrm(lk[6], (D_MODEL, D_MODEL)), nrm(lk[7], (1, D_MODEL)),   # W_o, b_o
            jnp.ones((1, D_MODEL), jnp.float32), jnp.zeros((1, D_MODEL), jnp.float32),  # norm1
            jnp.ones((1, D_MODEL), jnp.float32), jnp.zeros((1, D_MODEL), jnp.float32),  # norm2
            nrm(lk[8], (D_MODEL, D_FF)), nrm(lk[9], (1, D_FF)),          # ff linear1
            nrm(lk[10], (D_FF, D_MODEL)), nrm(lk[11], (1, D_MODEL)),     # ff linear2
        )
        params["layers"].append(layer)
    return params


if __name__ == "__main__":
    root = jax.random.PRNGKey(0)
    k_tok, k_par = jax.random.split(root)
    tokens = jax.random.randint(k_tok, (BATCH, SEQ), 0, VOCAB, dtype=jnp.int32)
    params = init_params(k_par)
    packed = pack_params(params)

    logits, all_probs = model_forward(tokens, packed)
    logits = jax.block_until_ready(logits)
    all_probs = [jax.block_until_ready(p) for p in all_probs]

    # correctness check against a pure-JAX reference
    ref_logits, ref_probs = ref_forward(tokens, params)
    np.testing.assert_allclose(np.asarray(logits), np.asarray(ref_logits),
                               rtol=1e-4, atol=2e-4)
    for p, rp in zip(all_probs, ref_probs):
        np.testing.assert_allclose(np.asarray(p), np.asarray(rp),
                                   rtol=1e-4, atol=2e-4)

    assert logits.shape == (BATCH, SEQ, VOCAB)
    assert all(p.shape == (BATCH, NUM_HEADS, SEQ, SEQ) for p in all_probs)
    print("KERNEL_OK")
</pallas_src>

<mosaic_0001>
module attributes {stable_mosaic.version = 11 : i64} {
  func.func @fused_forward_kernel(%arg0: memref<16x1xi32, #tpu.memory_space<vmem>>, %arg1: memref<432x128xf32, #tpu.memory_space<vmem>>, %arg2: memref<24x128xf32, #tpu.memory_space<vmem>>, %arg3: memref<16x128xf32, #tpu.memory_space<vmem>>, %arg4: memref<8x128xf32, #tpu.memory_space<vmem>>) attributes {dimension_semantics = [], scalar_prefetch = 0 : i64, scratch_operands = 0 : i64, tpu.core_type = #tpu.core_type<tc>} {
    %c0 = arith.constant 0 : index
    %c0_0 = arith.constant 0 : index
    %0 = vector.load %arg0[%c0, %c0_0] : memref<16x1xi32, #tpu.memory_space<vmem>>, vector<16x1xi32>
    %1 = tpu.iota {dimensions = array<i32: 1>} : vector<16x80xi32>
    %2 = tpu.iota {dimensions = array<i32: 0>} : vector<16x80xi32>
    %3 = vector.broadcast %0 : vector<16x1xi32> to vector<16x80xi32>
    %4 = arith.cmpi eq, %1, %3 : vector<16x80xi32>
    %c64_i32 = arith.constant 64 : i32
    %5 = vector.broadcast %c64_i32 : i32 to vector<16x80xi32>
    %6 = arith.addi %2, %5 : vector<16x80xi32>
    %7 = arith.cmpi eq, %1, %6 : vector<16x80xi32>
    %8 = arith.ori %4, %7 : vector<16x80xi1>
    %9 = arith.extui %8 : vector<16x80xi1> to vector<16x80xi32>
    %10 = arith.sitofp %9 : vector<16x80xi32> to vector<16x80xf32>
    %c0_1 = arith.constant 0 : index
    %c0_2 = arith.constant 0 : index
    %11 = vector.load %arg1[%c0_1, %c0_2] : memref<432x128xf32, #tpu.memory_space<vmem>>, vector<80x32xf32>
    %cst = arith.constant dense<0.000000e+00> : vector<16x32xf32>
    %12 = tpu.matmul %10, %11, %cst {dimension_numbers = #tpu.dot_dimension_numbers<[1], [0], [0], [1], [0, 0, 1, 1], [], []>} : vector<16x80xf32>, vector<80x32xf32>, vector<16x32xf32> -> vector<16x32xf32>
    %c80 = arith.constant 80 : index
    %c0_3 = arith.constant 0 : index
    %13 = vector.load %arg1[%c80, %c0_3] : memref<432x128xf32, #tpu.memory_space<vmem>>, vector<32x96xf32>
    %cst_4 = arith.constant dense<0.000000e+00> : vector<16x96xf32>
    %14 = tpu.matmul %12, %13, %cst_4 {dimension_numbers = #tpu.dot_dimension_numbers<[1], [0], [0], [1], [0, 0, 1, 1], [], []>} : vector<16x32xf32>, vector<32x96xf32>, vector<16x96xf32> -> vector<16x96xf32>
    %c0_5 = arith.constant 0 : index
    %c0_6 = arith.constant 0 : index
    %15 = vector.load %arg2[%c0_5, %c0_6] : memref<24x128xf32, #tpu.memory_space<vmem>>, vector<1x96xf32>
    %16 = vector.broadcast %15 : vector<1x96xf32> to vector<16x96xf32>
    %17 = arith.addf %14, %16 : vector<16x96xf32>
    %18 = vector.extract_strided_slice %17 {offsets = [0, 0], sizes = [16, 8], strides = [1, 1]} : vector<16x96xf32> to vector<16x8xf32>
    %19 = vector.shape_cast %18 : vector<16x8xf32> to vector<2x8x8xf32>
    %20 = vector.extract_strided_slice %17 {offsets = [0, 8], sizes = [16, 8], strides = [1, 1]} : vector<16x96xf32> to vector<16x8xf32>
    %21 = vector.shape_cast %20 : vector<16x8xf32> to vector<2x8x8xf32>
    %22 = vector.extract_strided_slice %17 {offsets = [0, 16], sizes = [16, 8], strides = [1, 1]} : vector<16x96xf32> to vector<16x8xf32>
    %23 = vector.shape_cast %22 : vector<16x8xf32> to vector<2x8x8xf32>
    %24 = vector.extract_strided_slice %17 {offsets = [0, 24], sizes = [16, 8], strides = [1, 1]} : vector<16x96xf32> to vector<16x8xf32>
    %25 = vector.shape_cast %24 : vector<16x8xf32> to vector<2x8x8xf32>
    %26 = vector.shape_cast %19 : vector<2x8x8xf32> to vector<2x1x8x8xf32>
    %27 = vector.shape_cast %21 : vector<2x8x8xf32> to vector<2x1x8x8xf32>
    %28 = vector.shape_cast %23 : vector<2x8x8xf32> to vector<2x1x8x8xf32>
    %29 = vector.shape_cast %25 : vector<2x8x8xf32> to vector<2x1x8x8xf32>
    %30 = tpu.concatenate %26, %27, %28, %29 in 1 : vector<2x1x8x8xf32>, vector<2x1x8x8xf32>, vector<2x1x8x8xf32>, vector<2x1x8x8xf32> -> vector<2x4x8x8xf32>
    %31 = vector.shape_cast %30 : vector<2x4x8x8xf32> to vector<8x8x8xf32>
    %32 = vector.extract_strided_slice %17 {offsets = [0, 32], sizes = [16, 8], strides = [1, 1]} : vector<16x96xf32> to vector<16x8xf32>
    %33 = vector.shape_cast %32 : vector<16x8xf32> to vector<2x8x8xf32>
    %34 = vector.extract_strided_slice %17 {offsets = [0, 40], sizes = [16, 8], strides = [1, 1]} : vector<16x96xf32> to vector<16x8xf32>
    %35 = vector.shape_cast %34 : vector<16x8xf32> to vector<2x8x8xf32>
    %36 = vector.extract_strided_slice %17 {offsets = [0, 48], sizes = [16, 8], strides = [1, 1]} : vector<16x96xf32> to vector<16x8xf32>
    %37 = vector.shape_cast %36 : vector<16x8xf32> to vector<2x8x8xf32>
    %38 = vector.extract_strided_slice %17 {offsets = [0, 56], sizes = [16, 8], strides = [1, 1]} : vector<16x96xf32> to vector<16x8xf32>
    %39 = vector.shape_cast %38 : vector<16x8xf32> to vector<2x8x8xf32>
    %40 = vector.shape_cast %33 : vector<2x8x8xf32> to vector<2x1x8x8xf32>
    %41 = vector.shape_cast %35 : vector<2x8x8xf32> to vector<2x1x8x8xf32>
    %42 = vector.shape_cast %37 : vector<2x8x8xf32> to vector<2x1x8x8xf32>
    %43 = vector.shape_cast %39 : vector<2x8x8xf32> to vector<2x1x8x8xf32>
    %44 = tpu.concatenate %40, %41, %42, %43 in 1 : vector<2x1x8x8xf32>, vector<2x1x8x8xf32>, vector<2x1x8x8xf32>, vector<2x1x8x8xf32> -> vector<2x4x8x8xf32>
    %45 = vector.shape_cast %44 : vector<2x4x8x8xf32> to vector<8x8x8xf32>
    %46 = vector.extract_strided_slice %17 {offsets = [0, 64], sizes = [16, 8], strides = [1, 1]} : vector<16x96xf32> to vector<16x8xf32>
    %47 = vector.shape_cast %46 : vector<16x8xf32> to vector<2x8x8xf32>
    %48 = vector.extract_strided_slice %17 {offsets = [0, 72], sizes = [16, 8], strides = [1, 1]} : vector<16x96xf32> to vector<16x8xf32>
    %49 = vector.shape_cast %48 : vector<16x8xf32> to vector<2x8x8xf32>
    %50 = vector.extract_strided_slice %17 {offsets = [0, 80], sizes = [16, 8], strides = [1, 1]} : vector<16x96xf32> to vector<16x8xf32>
    %51 = vector.shape_cast %50 : vector<16x8xf32> to vector<2x8x8xf32>
    %52 = vector.extract_strided_slice %17 {offsets = [0, 88], sizes = [16, 8], strides = [1, 1]} : vector<16x96xf32> to vector<16x8xf32>
    %53 = vector.shape_cast %52 : vector<16x8xf32> to vector<2x8x8xf32>
    %54 = vector.shape_cast %47 : vector<2x8x8xf32> to vector<2x1x8x8xf32>
    %55 = vector.shape_cast %49 : vector<2x8x8xf32> to vector<2x1x8x8xf32>
    %56 = vector.shape_cast %51 : vector<2x8x8xf32> to vector<2x1x8x8xf32>
    %57 = vector.shape_cast %53 : vector<2x8x8xf32> to vector<2x1x8x8xf32>
    %58 = tpu.concatenate %54, %55, %56, %57 in 1 : vector<2x1x8x8xf32>, vector<2x1x8x8xf32>, vector<2x1x8x8xf32>, vector<2x1x8x8xf32> -> vector<2x4x8x8xf32>
    %59 = vector.shape_cast %58 : vector<2x4x8x8xf32> to vector<8x8x8xf32>
    "tpu.trace_start"() <{level = 10 : i32, message = "nqd,nkd->nqk"}> : () -> ()
    %cst_7 = arith.constant dense<0.000000e+00> : vector<8x8x8xf32>
    %60 = tpu.matmul %31, %45, %cst_7 {dimension_numbers = #tpu.dot_dimension_numbers<[2], [2], [1], [1], [0, 0, 0, 1, 1, 1], [0], [0]>} : vector<8x8x8xf32>, vector<8x8x8xf32>, vector<8x8x8xf32> -> vector<8x8x8xf32>
    "tpu.trace_stop"() : () -> ()
    %cst_8 = arith.constant dense<0xFF800000> : vector<8x8xf32>
    %61 = vector.multi_reduction <maximumf>, %60, %cst_8 [2] : vector<8x8x8xf32> to vector<8x8xf32>
    %62 = vector.shape_cast %61 : vector<8x8xf32> to vector<8x8x1xf32>
    %63 = vector.broadcast %62 : vector<8x8x1xf32> to vector<8x8x8xf32>
    %64 = arith.subf %60, %63 : vector<8x8x8xf32>
    %65 = math.exp %64 : vector<8x8x8xf32>
    %cst_9 = arith.constant dense<0.000000e+00> : vector<8x8xf32>
    %66 = vector.multi_reduction <add>, %65, %cst_9 [2] : vector<8x8x8xf32> to vector<8x8xf32>
    %67 = vector.shape_cast %66 : vector<8x8xf32> to vector<8x8x1xf32>
    %68 = tpu.reciprocal %67 : vector<8x8x1xf32> -> vector<8x8x1xf32>
    %69 = vector.broadcast %68 : vector<8x8x1xf32> to vector<8x8x8xf32>
    %70 = arith.mulf %65, %69 : vector<8x8x8xf32>
    %71 = vector.extract_strided_slice %70 {offsets = [0, 0, 0], sizes = [1, 8, 8], strides = [1, 1, 1]} : vector<8x8x8xf32> to vector<1x8x8xf32>
    %72 = vector.shape_cast %71 : vector<1x8x8xf32> to vector<8x8xf32>
    %73 = vector.extract_strided_slice %70 {offsets = [1, 0, 0], sizes = [1, 8, 8], strides = [1, 1, 1]} : vector<8x8x8xf32> to vector<1x8x8xf32>
    %74 = vector.shape_cast %73 : vector<1x8x8xf32> to vector<8x8xf32>
    %75 = vector.extract_strided_slice %70 {offsets = [2, 0, 0], sizes = [1, 8, 8], strides = [1, 1, 1]} : vector<8x8x8xf32> to vector<1x8x8xf32>
    %76 = vector.shape_cast %75 : vector<1x8x8xf32> to vector<8x8xf32>
    %77 = vector.extract_strided_slice %70 {offsets = [3, 0, 0], sizes = [1, 8, 8], strides = [1, 1, 1]} : vector<8x8x8xf32> to vector<1x8x8xf32>
    %78 = vector.shape_cast %77 : vector<1x8x8xf32> to vector<8x8xf32>
    %79 = vector.extract_strided_slice %70 {offsets = [4, 0, 0], sizes = [1, 8, 8], strides = [1, 1, 1]} : vector<8x8x8xf32> to vector<1x8x8xf32>
    %80 = vector.shape_cast %79 : vector<1x8x8xf32> to vector<8x8xf32>
    %81 = vector.extract_strided_slice %70 {offsets = [5, 0, 0], sizes = [1, 8, 8], strides = [1, 1, 1]} : vector<8x8x8xf32> to vector<1x8x8xf32>
    %82 = vector.shape_cast %81 : vector<1x8x8xf32> to vector<8x8xf32>
    %83 = vector.extract_strided_slice %70 {offsets = [6, 0, 0], sizes = [1, 8, 8], strides = [1, 1, 1]} : vector<8x8x8xf32> to vector<1x8x8xf32>
    %84 = vector.shape_cast %83 : vector<1x8x8xf32> to vector<8x8xf32>
    %85 = vector.extract_strided_slice %70 {offsets = [7, 0, 0], sizes = [1, 8, 8], strides = [1, 1, 1]} : vector<8x8x8xf32> to vector<1x8x8xf32>
    %86 = vector.shape_cast %85 : vector<1x8x8xf32> to vector<8x8xf32>
    "tpu.trace_start"() <{level = 10 : i32, message = "nqk,nkd->nqd"}> : () -> ()
    %cst_10 = arith.constant dense<0.000000e+00> : vector<8x8x8xf32>
    %87 = tpu.matmul %70, %59, %cst_10 {dimension_numbers = #tpu.dot_dimension_numbers<[2], [1], [1], [2], [0, 0, 0, 1, 1, 2], [0], [0]>} : vector<8x8x8xf32>, vector<8x8x8xf32>, vector<8x8x8xf32> -> vector<8x8x8xf32>
    "tpu.trace_stop"() : () -> ()
    %88 = vector.shape_cast %87 : vector<8x8x8xf32> to vector<2x4x8x8xf32>
    %89 = vector.extract_strided_slice %88 {offsets = [0, 0, 0, 0], sizes = [2, 1, 8, 8], strides = [1, 1, 1, 1]} : vector<2x4x8x8xf32> to vector<2x1x8x8xf32>
    %90 = vector.shape_cast %89 : vector<2x1x8x8xf32> to vector<2x8x8xf32>
    %91 = vector.shape_cast %90 : vector<2x8x8xf32> to vector<16x8xf32>
    %92 = vector.extract_strided_slice %88 {offsets = [0, 1, 0, 0], sizes = [2, 1, 8, 8], strides = [1, 1, 1, 1]} : vector<2x4x8x8xf32> to vector<2x1x8x8xf32>
    %93 = vector.shape_cast %92 : vector<2x1x8x8xf32> to vector<2x8x8xf32>
    %94 = vector.shape_cast %93 : vector<2x8x8xf32> to vector<16x8xf32>
    %95 = vector.extract_strided_slice %88 {offsets = [0, 2, 0, 0], sizes = [2, 1, 8, 8], strides = [1, 1, 1, 1]} : vector<2x4x8x8xf32> to vector<2x1x8x8xf32>
    %96 = vector.shape_cast %95 : vector<2x1x8x8xf32> to vector<2x8x8xf32>
    %97 = vector.shape_cast %96 : vector<2x8x8xf32> to vector<16x8xf32>
    %98 = vector.extract_strided_slice %88 {offsets = [0, 3, 0, 0], sizes = [2, 1, 8, 8], strides = [1, 1, 1, 1]} : vector<2x4x8x8xf32> to vector<2x1x8x8xf32>
    %99 = vector.shape_cast %98 : vector<2x1x8x8xf32> to vector<2x8x8xf32>
    %100 = vector.shape_cast %99 : vector<2x8x8xf32> to vector<16x8xf32>
    %101 = tpu.concatenate %91, %94, %97, %100 in 1 : vector<16x8xf32>, vector<16x8xf32>, vector<16x8xf32>, vector<16x8xf32> -> vector<16x32xf32>
    %c112 = arith.constant 112 : index
    %c0_11 = arith.constant 0 : index
    %102 = vector.load %arg1[%c112, %c0_11] : memref<432x128xf32, #tpu.memory_space<vmem>>, vector<32x32xf32>
    %cst_12 = arith.constant dense<0.000000e+00> : vector<16x32xf32>
    %103 = tpu.matmul %101, %102, %cst_12 {dimension_numbers = #tpu.dot_dimension_numbers<[1], [0], [0], [1], [0, 0, 1, 1], [], []>} : vector<16x32xf32>, vector<32x32xf32>, vector<16x32xf32> -> vector<16x32xf32>
    %c1 = arith.constant 1 : index
    %c0_13 = arith.constant 0 : index
    %104 = vector.load %arg2[%c1, %c0_13] : memref<24x128xf32, #tpu.memory_space<vmem>>, vector<1x32xf32>
    %105 = vector.broadcast %104 : vector<1x32xf32> to vector<16x32xf32>
    %106 = arith.addf %103, %105 : vector<16x32xf32>
    %107 = arith.addf %12, %106 : vector<16x32xf32>
    %c4 = arith.constant 4 : index
    %c0_14 = arith.constant 0 : index
    %108 = vector.load %arg2[%c4, %c0_14] : memref<24x128xf32, #tpu.memory_space<vmem>>, vector<1x32xf32>
    %c5 = arith.constant 5 : index
    %c0_15 = arith.constant 0 : index
    %109 = vector.load %arg2[%c5, %c0_15] : memref<24x128xf32, #tpu.memory_space<vmem>>, vector<1x32xf32>
    %cst_16 = arith.constant dense<0.000000e+00> : vector<16xf32>
    %110 = vector.multi_reduction <add>, %107, %cst_16 [1] : vector<16x32xf32> to vector<16xf32>
    %111 = vector.shape_cast %110 : vector<16xf32> to vector<16x1xf32>
    %cst_17 = arith.constant 3.200000e+01 : f32
    %112 = vector.broadcast %cst_17 : f32 to vector<16x1xf32>
    %113 = arith.divf %111, %112 : vector<16x1xf32>
    %114 = vector.broadcast %113 : vector<16x1xf32> to vector<16x32xf32>
    %115 = arith.subf %107, %114 : vector<16x32xf32>
    %116 = arith.mulf %115, %115 : vector<16x32xf32>
    %cst_18 = arith.constant dense<0.000000e+00> : vector<16xf32>
    %117 = vector.multi_reduction <add>, %116, %cst_18 [1] : vector<16x32xf32> to vector<16xf32>
    %118 = vector.shape_cast %117 : vector<16xf32> to vector<16x1xf32>
    %cst_19 = arith.constant 3.200000e+01 : f32
    %119 = vector.broadcast %cst_19 : f32 to vector<16x1xf32>
    %120 = arith.divf %118, %119 : vector<16x1xf32>
    %121 = vector.broadcast %113 : vector<16x1xf32> to vector<16x32xf32>
    %122 = arith.subf %107, %121 : vector<16x32xf32>
    %cst_20 = arith.constant 9.99999974E-6 : f32
    %123 = vector.broadcast %cst_20 : f32 to vector<16x1xf32>
    %124 = arith.addf %120, %123 : vector<16x1xf32>
    %125 = math.rsqrt %124 : vector<16x1xf32>
    %126 = vector.broadcast %125 : vector<16x1xf32> to vector<16x32xf32>
    %127 = arith.mulf %122, %126 : vector<16x32xf32>
    %128 = vector.broadcast %108 : vector<1x32xf32> to vector<16x32xf32>
    %129 = arith.mulf %127, %128 : vector<16x32xf32>
    %130 = vector.broadcast %109 : vector<1x32xf32> to vector<16x32xf32>
    %131 = arith.addf %129, %130 : vector<16x32xf32>
    %c144 = arith.constant 144 : index
    %c0_21 = arith.constant 0 : index
    %132 = vector.load %arg1[%c144, %c0_21] : memref<432x128xf32, #tpu.memory_space<vmem>>, vector<32x64xf32>
    %cst_22 = arith.constant dense<0.000000e+00> : vector<16x64xf32>
    %133 = tpu.matmul %131, %132, %cst_22 {dimension_numbers = #tpu.dot_dimension_numbers<[1], [0], [0], [1], [0, 0, 1, 1], [], []>} : vector<16x32xf32>, vector<32x64xf32>, vector<16x64xf32> -> vector<16x64xf32>
    %c2 = arith.constant 2 : index
    %c0_23 = arith.constant 0 : index
    %134 = vector.load %arg2[%c2, %c0_23] : memref<24x128xf32, #tpu.memory_space<vmem>>, vector<1x64xf32>
    %135 = vector.broadcast %134 : vector<1x64xf32> to vector<16x64xf32>
    %136 = arith.addf %133, %135 : vector<16x64xf32>
    %cst_24 = arith.constant 0.000000e+00 : f32
    %137 = vector.broadcast %cst_24 : f32 to vector<16x64xf32>
    %138 = arith.maximumf %136, %137 : vector<16x64xf32>
    %c176 = arith.constant 176 : index
    %c0_25 = arith.constant 0 : index
    %139 = vector.load %arg1[%c176, %c0_25] : memref<432x128xf32, #tpu.memory_space<vmem>>, vector<64x32xf32>
    %cst_26 = arith.constant dense<0.000000e+00> : vector<16x32xf32>
    %140 = tpu.matmul %138, %139, %cst_26 {dimension_numbers = #tpu.dot_dimension_numbers<[1], [0], [0], [1], [0, 0, 1, 1], [], []>} : vector<16x64xf32>, vector<64x32xf32>, vector<16x32xf32> -> vector<16x32xf32>
    %c3 = arith.constant 3 : index
    %c0_27 = arith.constant 0 : index
    %141 = vector.load %arg2[%c3, %c0_27] : memref<24x128xf32, #tpu.memory_space<vmem>>, vector<1x32xf32>
    %142 = vector.broadcast %141 : vector<1x32xf32> to vector<16x32xf32>
    %143 = arith.addf %140, %142 : vector<16x32xf32>
    %144 = arith.addf %131, %143 : vector<16x32xf32>
    %c6 = arith.constant 6 : index
    %c0_28 = arith.constant 0 : index
    %145 = vector.load %arg2[%c6, %c0_28] : memref<24x128xf32, #tpu.memory_space<vmem>>, vector<1x32xf32>
    %c7 = arith.constant 7 : index
    %c0_29 = arith.constant 0 : index
    %146 = vector.load %arg2[%c7, %c0_29] : memref<24x128xf32, #tpu.memory_space<vmem>>, vector<1x32xf32>
    %cst_30 = arith.constant dense<0.000000e+00> : vector<16xf32>
    %147 = vector.multi_reduction <add>, %144, %cst_30 [1] : vector<16x32xf32> to vector<16xf32>
    %148 = vector.shape_cast %147 : vector<16xf32> to vector<16x1xf32>
    %cst_31 = arith.constant 3.200000e+01 : f32
    %149 = vector.broadcast %cst_31 : f32 to vector<16x1xf32>
    %150 = arith.divf %148, %149 : vector<16x1xf32>
    %151 = vector.broadcast %150 : vector<16x1xf32> to vector<16x32xf32>
    %152 = arith.subf %144, %151 : vector<16x32xf32>
    %153 = arith.mulf %152, %152 : vector<16x32xf32>
    %cst_32 = arith.constant dense<0.000000e+00> : vector<16xf32>
    %154 = vector.multi_reduction <add>, %153, %cst_32 [1] : vector<16x32xf32> to vector<16xf32>
    %155 = vector.shape_cast %154 : vector<16xf32> to vector<16x1xf32>
    %cst_33 = arith.constant 3.200000e+01 : f32
    %156 = vector.broadcast %cst_33 : f32 to vector<16x1xf32>
    %157 = arith.divf %155, %156 : vector<16x1xf32>
    %158 = vector.broadcast %150 : vector<16x1xf32> to vector<16x32xf32>
    %159 = arith.subf %144, %158 : vector<16x32xf32>
    %cst_34 = arith.constant 9.99999974E-6 : f32
    %160 = vector.broadcast %cst_34 : f32 to vector<16x1xf32>
    %161 = arith.addf %157, %160 : vector<16x1xf32>
    %162 = math.rsqrt %161 : vector<16x1xf32>
    %163 = vector.broadcast %162 : vector<16x1xf32> to vector<16x32xf32>
    %164 = arith.mulf %159, %163 : vector<16x32xf32>
    %165 = vector.broadcast %145 : vector<1x32xf32> to vector<16x32xf32>
    %166 = arith.mulf %164, %165 : vector<16x32xf32>
    %167 = vector.broadcast %146 : vector<1x32xf32> to vector<16x32xf32>
    %168 = arith.addf %166, %167 : vector<16x32xf32>
    %c240 = arith.constant 240 : index
    %c0_35 = arith.constant 0 : index
    %169 = vector.load %arg1[%c240, %c0_35] : memref<432x128xf32, #tpu.memory_space<vmem>>, vector<32x96xf32>
    %cst_36 = arith.constant dense<0.000000e+00> : vector<16x96xf32>
    %170 = tpu.matmul %168, %169, %cst_36 {dimension_numbers = #tpu.dot_dimension_numbers<[1], [0], [0], [1], [0, 0, 1, 1], [], []>} : vector<16x32xf32>, vector<32x96xf32>, vector<16x96xf32> -> vector<16x96xf32>
    %c8 = arith.constant 8 : index
    %c0_37 = arith.constant 0 : index
    %171 = vector.load %arg2[%c8, %c0_37] : memref<24x128xf32, #tpu.memory_space<vmem>>, vector<1x96xf32>
    %172 = vector.broadcast %171 : vector<1x96xf32> to vector<16x96xf32>
    %173 = arith.addf %170, %172 : vector<16x96xf32>
    %174 = vector.extract_strided_slice %173 {offsets = [0, 0], sizes = [16, 8], strides = [1, 1]} : vector<16x96xf32> to vector<16x8xf32>
    %175 = vector.shape_cast %174 : vector<16x8xf32> to vector<2x8x8xf32>
    %176 = vector.extract_strided_slice %173 {offsets = [0, 8], sizes = [16, 8], strides = [1, 1]} : vector<16x96xf32> to vector<16x8xf32>
    %177 = vector.shape_cast %176 : vector<16x8xf32> to vector<2x8x8xf32>
    %178 = vector.extract_strided_slice %173 {offsets = [0, 16], sizes = [16, 8], strides = [1, 1]} : vector<16x96xf32> to vector<16x8xf32>
    %179 = vector.shape_cast %178 : vector<16x8xf32> to vector<2x8x8xf32>
    %180 = vector.extract_strided_slice %173 {offsets = [0, 24], sizes = [16, 8], strides = [1, 1]} : vector<16x96xf32> to vector<16x8xf32>
    %181 = vector.shape_cast %180 : vector<16x8xf32> to vector<2x8x8xf32>
    %182 = vector.shape_cast %175 : vector<2x8x8xf32> to vector<2x1x8x8xf32>
    %183 = vector.shape_cast %177 : vector<2x8x8xf32> to vector<2x1x8x8xf32>
    %184 = vector.shape_cast %179 : vector<2x8x8xf32> to vector<2x1x8x8xf32>
    %185 = vector.shape_cast %181 : vector<2x8x8xf32> to vector<2x1x8x8xf32>
    %186 = tpu.concatenate %182, %183, %184, %185 in 1 : vector<2x1x8x8xf32>, vector<2x1x8x8xf32>, vector<2x1x8x8xf32>, vector<2x1x8x8xf32> -> vector<2x4x8x8xf32>
    %187 = vector.shape_cast %186 : vector<2x4x8x8xf32> to vector<8x8x8xf32>
    %188 = vector.extract_strided_slice %173 {offsets = [0, 32], sizes = [16, 8], strides = [1, 1]} : vector<16x96xf32> to vector<16x8xf32>
    %189 = vector.shape_cast %188 : vector<16x8xf32> to vector<2x8x8xf32>
    %190 = vector.extract_strided_slice %173 {offsets = [0, 40], sizes = [16, 8], strides = [1, 1]} : vector<16x96xf32> to vector<16x8xf32>
    %191 = vector.shape_cast %190 : vector<16x8xf32> to vector<2x8x8xf32>
    %192 = vector.extract_strided_slice %173 {offsets = [0, 48], sizes = [16, 8], strides = [1, 1]} : vector<16x96xf32> to vector<16x8xf32>
    %193 = vector.shape_cast %192 : vector<16x8xf32> to vector<2x8x8xf32>
    %194 = vector.extract_strided_slice %173 {offsets = [0, 56], sizes = [16, 8], strides = [1, 1]} : vector<16x96xf32> to vector<16x8xf32>
    %195 = vector.shape_cast %194 : vector<16x8xf32> to vector<2x8x8xf32>
    %196 = vector.shape_cast %189 : vector<2x8x8xf32> to vector<2x1x8x8xf32>
    %197 = vector.shape_cast %191 : vector<2x8x8xf32> to vector<2x1x8x8xf32>
    %198 = vector.shape_cast %193 : vector<2x8x8xf32> to vector<2x1x8x8xf32>
    %199 = vector.shape_cast %195 : vector<2x8x8xf32> to vector<2x1x8x8xf32>
    %200 = tpu.concatenate %196, %197, %198, %199 in 1 : vector<2x1x8x8xf32>, vector<2x1x8x8xf32>, vector<2x1x8x8xf32>, vector<2x1x8x8xf32> -> vector<2x4x8x8xf32>
    %201 = vector.shape_cast %200 : vector<2x4x8x8xf32> to vector<8x8x8xf32>
    %202 = vector.extract_strided_slice %173 {offsets = [0, 64], sizes = [16, 8], strides = [1, 1]} : vector<16x96xf32> to vector<16x8xf32>
    %203 = vector.shape_cast %202 : vector<16x8xf32> to vector<2x8x8xf32>
    %204 = vector.extract_strided_slice %173 {offsets = [0, 72], sizes = [16, 8], strides = [1, 1]} : vector<16x96xf32> to vector<16x8xf32>
    %205 = vector.shape_cast %204 : vector<16x8xf32> to vector<2x8x8xf32>
    %206 = vector.extract_strided_slice %173 {offsets = [0, 80], sizes = [16, 8], strides = [1, 1]} : vector<16x96xf32> to vector<16x8xf32>
    %207 = vector.shape_cast %206 : vector<16x8xf32> to vector<2x8x8xf32>
    %208 = vector.extract_strided_slice %173 {offsets = [0, 88], sizes = [16, 8], strides = [1, 1]} : vector<16x96xf32> to vector<16x8xf32>
    %209 = vector.shape_cast %208 : vector<16x8xf32> to vector<2x8x8xf32>
    %210 = vector.shape_cast %203 : vector<2x8x8xf32> to vector<2x1x8x8xf32>
    %211 = vector.shape_cast %205 : vector<2x8x8xf32> to vector<2x1x8x8xf32>
    %212 = vector.shape_cast %207 : vector<2x8x8xf32> to vector<2x1x8x8xf32>
    %213 = vector.shape_cast %209 : vector<2x8x8xf32> to vector<2x1x8x8xf32>
    %214 = tpu.concatenate %210, %211, %212, %213 in 1 : vector<2x1x8x8xf32>, vector<2x1x8x8xf32>, vector<2x1x8x8xf32>, vector<2x1x8x8xf32> -> vector<2x4x8x8xf32>
    %215 = vector.shape_cast %214 : vector<2x4x8x8xf32> to vector<8x8x8xf32>
    "tpu.trace_start"() <{level = 10 : i32, message = "nqd,nkd->nqk"}> : () -> ()
    %cst_38 = arith.constant dense<0.000000e+00> : vector<8x8x8xf32>
    %216 = tpu.matmul %187, %201, %cst_38 {dimension_numbers = #tpu.dot_dimension_numbers<[2], [2], [1], [1], [0, 0, 0, 1, 1, 1], [0], [0]>} : vector<8x8x8xf32>, vector<8x8x8xf32>, vector<8x8x8xf32> -> vector<8x8x8xf32>
    "tpu.trace_stop"() : () -> ()
    %cst_39 = arith.constant dense<0xFF800000> : vector<8x8xf32>
    %217 = vector.multi_reduction <maximumf>, %216, %cst_39 [2] : vector<8x8x8xf32> to vector<8x8xf32>
    %218 = vector.shape_cast %217 : vector<8x8xf32> to vector<8x8x1xf32>
    %219 = vector.broadcast %218 : vector<8x8x1xf32> to vector<8x8x8xf32>
    %220 = arith.subf %216, %219 : vector<8x8x8xf32>
    %221 = math.exp %220 : vector<8x8x8xf32>
    %cst_40 = arith.constant dense<0.000000e+00> : vector<8x8xf32>
    %222 = vector.multi_reduction <add>, %221, %cst_40 [2] : vector<8x8x8xf32> to vector<8x8xf32>
    %223 = vector.shape_cast %222 : vector<8x8xf32> to vector<8x8x1xf32>
    %224 = tpu.reciprocal %223 : vector<8x8x1xf32> -> vector<8x8x1xf32>
    %225 = vector.broadcast %224 : vector<8x8x1xf32> to vector<8x8x8xf32>
    %226 = arith.mulf %221, %225 : vector<8x8x8xf32>
    %227 = vector.extract_strided_slice %226 {offsets = [0, 0, 0], sizes = [1, 8, 8], strides = [1, 1, 1]} : vector<8x8x8xf32> to vector<1x8x8xf32>
    %228 = vector.shape_cast %227 : vector<1x8x8xf32> to vector<8x8xf32>
    %229 = vector.extract_strided_slice %226 {offsets = [1, 0, 0], sizes = [1, 8, 8], strides = [1, 1, 1]} : vector<8x8x8xf32> to vector<1x8x8xf32>
    %230 = vector.shape_cast %229 : vector<1x8x8xf32> to vector<8x8xf32>
    %231 = vector.extract_strided_slice %226 {offsets = [2, 0, 0], sizes = [1, 8, 8], strides = [1, 1, 1]} : vector<8x8x8xf32> to vector<1x8x8xf32>
    %232 = vector.shape_cast %231 : vector<1x8x8xf32> to vector<8x8xf32>
    %233 = vector.extract_strided_slice %226 {offsets = [3, 0, 0], sizes = [1, 8, 8], strides = [1, 1, 1]} : vector<8x8x8xf32> to vector<1x8x8xf32>
    %234 = vector.shape_cast %233 : vector<1x8x8xf32> to vector<8x8xf32>
    %235 = vector.extract_strided_slice %226 {offsets = [4, 0, 0], sizes = [1, 8, 8], strides = [1, 1, 1]} : vector<8x8x8xf32> to vector<1x8x8xf32>
    %236 = vector.shape_cast %235 : vector<1x8x8xf32> to vector<8x8xf32>
    %237 = vector.extract_strided_slice %226 {offsets = [5, 0, 0], sizes = [1, 8, 8], strides = [1, 1, 1]} : vector<8x8x8xf32> to vector<1x8x8xf32>
    %238 = vector.shape_cast %237 : vector<1x8x8xf32> to vector<8x8xf32>
    %239 = vector.extract_strided_slice %226 {offsets = [6, 0, 0], sizes = [1, 8, 8], strides = [1, 1, 1]} : vector<8x8x8xf32> to vector<1x8x8xf32>
    %240 = vector.shape_cast %239 : vector<1x8x8xf32> to vector<8x8xf32>
    %241 = vector.extract_strided_slice %226 {offsets = [7, 0, 0], sizes = [1, 8, 8], strides = [1, 1, 1]} : vector<8x8x8xf32> to vector<1x8x8xf32>
    %242 = vector.shape_cast %241 : vector<1x8x8xf32> to vector<8x8xf32>
    "tpu.trace_start"() <{level = 10 : i32, message = "nqk,nkd->nqd"}> : () -> ()
    %cst_41 = arith.constant dense<0.000000e+00> : vector<8x8x8xf32>
    %243 = tpu.matmul %226, %215, %cst_41 {dimension_numbers = #tpu.dot_dimension_numbers<[2], [1], [1], [2], [0, 0, 0, 1, 1, 2], [0], [0]>} : vector<8x8x8xf32>, vector<8x8x8xf32>, vector<8x8x8xf32> -> vector<8x8x8xf32>
    "tpu.trace_stop"() : () -> ()
    %244 = vector.shape_cast %243 : vector<8x8x8xf32> to vector<2x4x8x8xf32>
    %245 = vector.extract_strided_slice %244 {offsets = [0, 0, 0, 0], sizes = [2, 1, 8, 8], strides = [1, 1, 1, 1]} : vector<2x4x8x8xf32> to vector<2x1x8x8xf32>
    %246 = vector.shape_cast %245 : vector<2x1x8x8xf32> to vector<2x8x8xf32>
    %247 = vector.shape_cast %246 : vector<2x8x8xf32> to vector<16x8xf32>
    %248 = vector.extract_strided_slice %244 {offsets = [0, 1, 0, 0], sizes = [2, 1, 8, 8], strides = [1, 1, 1, 1]} : vector<2x4x8x8xf32> to vector<2x1x8x8xf32>
    %249 = vector.shape_cast %248 : vector<2x1x8x8xf32> to vector<2x8x8xf32>
    %250 = vector.shape_cast %249 : vector<2x8x8xf32> to vector<16x8xf32>
    %251 = vector.extract_strided_slice %244 {offsets = [0, 2, 0, 0], sizes = [2, 1, 8, 8], strides = [1, 1, 1, 1]} : vector<2x4x8x8xf32> to vector<2x1x8x8xf32>
    %252 = vector.shape_cast %251 : vector<2x1x8x8xf32> to vector<2x8x8xf32>
    %253 = vector.shape_cast %252 : vector<2x8x8xf32> to vector<16x8xf32>
    %254 = vector.extract_strided_slice %244 {offsets = [0, 3, 0, 0], sizes = [2, 1, 8, 8], strides = [1, 1, 1, 1]} : vector<2x4x8x8xf32> to vector<2x1x8x8xf32>
    %255 = vector.shape_cast %254 : vector<2x1x8x8xf32> to vector<2x8x8xf32>
    %256 = vector.shape_cast %255 : vector<2x8x8xf32> to vector<16x8xf32>
    %257 = tpu.concatenate %247, %250, %253, %256 in 1 : vector<16x8xf32>, vector<16x8xf32>, vector<16x8xf32>, vector<16x8xf32> -> vector<16x32xf32>
    %c272 = arith.constant 272 : index
    %c0_42 = arith.constant 0 : index
    %258 = vector.load %arg1[%c272, %c0_42] : memref<432x128xf32, #tpu.memory_space<vmem>>, vector<32x32xf32>
    %cst_43 = arith.constant dense<0.000000e+00> : vector<16x32xf32>
    %259 = tpu.matmul %257, %258, %cst_43 {dimension_numbers = #tpu.dot_dimension_numbers<[1], [0], [0], [1], [0, 0, 1, 1], [], []>} : vector<16x32xf32>, vector<32x32xf32>, vector<16x32xf32> -> vector<16x32xf32>
    %c9 = arith.constant 9 : index
    %c0_44 = arith.constant 0 : index
    %260 = vector.load %arg2[%c9, %c0_44] : memref<24x128xf32, #tpu.memory_space<vmem>>, vector<1x32xf32>
    %261 = vector.broadcast %260 : vector<1x32xf32> to vector<16x32xf32>
    %262 = arith.addf %259, %261 : vector<16x32xf32>
    %263 = arith.addf %168, %262 : vector<16x32xf32>
    %c12 = arith.constant 12 : index
    %c0_45 = arith.constant 0 : index
    %264 = vector.load %arg2[%c12, %c0_45] : memref<24x128xf32, #tpu.memory_space<vmem>>, vector<1x32xf32>
    %c13 = arith.constant 13 : index
    %c0_46 = arith.constant 0 : index
    %265 = vector.load %arg2[%c13, %c0_46] : memref<24x128xf32, #tpu.memory_space<vmem>>, vector<1x32xf32>
    %cst_47 = arith.constant dense<0.000000e+00> : vector<16xf32>
    %266 = vector.multi_reduction <add>, %263, %cst_47 [1] : vector<16x32xf32> to vector<16xf32>
    %267 = vector.shape_cast %266 : vector<16xf32> to vector<16x1xf32>
    %cst_48 = arith.constant 3.200000e+01 : f32
    %268 = vector.broadcast %cst_48 : f32 to vector<16x1xf32>
    %269 = arith.divf %267, %268 : vector<16x1xf32>
    %270 = vector.broadcast %269 : vector<16x1xf32> to vector<16x32xf32>
    %271 = arith.subf %263, %270 : vector<16x32xf32>
    %272 = arith.mulf %271, %271 : vector<16x32xf32>
    %cst_49 = arith.constant dense<0.000000e+00> : vector<16xf32>
    %273 = vector.multi_reduction <add>, %272, %cst_49 [1] : vector<16x32xf32> to vector<16xf32>
    %274 = vector.shape_cast %273 : vector<16xf32> to vector<16x1xf32>
    %cst_50 = arith.constant 3.200000e+01 : f32
    %275 = vector.broadcast %cst_50 : f32 to vector<16x1xf32>
    %276 = arith.divf %274, %275 : vector<16x1xf32>
    %277 = vector.broadcast %269 : vector<16x1xf32> to vector<16x32xf32>
    %278 = arith.subf %263, %277 : vector<16x32xf32>
    %cst_51 = arith.constant 9.99999974E-6 : f32
    %279 = vector.broadcast %cst_51 : f32 to vector<16x1xf32>
    %280 = arith.addf %276, %279 : vector<16x1xf32>
    %281 = math.rsqrt %280 : vector<16x1xf32>
    %282 = vector.broadcast %281 : vector<16x1xf32> to vector<16x32xf32>
    %283 = arith.mulf %278, %282 : vector<16x32xf32>
    %284 = vector.broadcast %264 : vector<1x32xf32> to vector<16x32xf32>
    %285 = arith.mulf %283, %284 : vector<16x32xf32>
    %286 = vector.broadcast %265 : vector<1x32xf32> to vector<16x32xf32>
    %287 = arith.addf %285, %286 : vector<16x32xf32>
    %c304 = arith.constant 304 : index
    %c0_52 = arith.constant 0 : index
    %288 = vector.load %arg1[%c304, %c0_52] : memref<432x128xf32, #tpu.memory_space<vmem>>, vector<32x64xf32>
    %cst_53 = arith.constant dense<0.000000e+00> : vector<16x64xf32>
    %289 = tpu.matmul %287, %288, %cst_53 {dimension_numbers = #tpu.dot_dimension_numbers<[1], [0], [0], [1], [0, 0, 1, 1], [], []>} : vector<16x32xf32>, vector<32x64xf32>, vector<16x64xf32> -> vector<16x64xf32>
    %c10 = arith.constant 10 : index
    %c0_54 = arith.constant 0 : index
    %290 = vector.load %arg2[%c10, %c0_54] : memref<24x128xf32, #tpu.memory_space<vmem>>, vector<1x64xf32>
    %291 = vector.broadcast %290 : vector<1x64xf32> to vector<16x64xf32>
    %292 = arith.addf %289, %291 : vector<16x64xf32>
    %cst_55 = arith.constant 0.000000e+00 : f32
    %293 = vector.broadcast %cst_55 : f32 to vector<16x64xf32>
    %294 = arith.maximumf %292, %293 : vector<16x64xf32>
    %c336 = arith.constant 336 : index
    %c0_56 = arith.constant 0 : index
    %295 = vector.load %arg1[%c336, %c0_56] : memref<432x128xf32, #tpu.memory_space<vmem>>, vector<64x32xf32>
    %cst_57 = arith.constant dense<0.000000e+00> : vector<16x32xf32>
    %296 = tpu.matmul %294, %295, %cst_57 {dimension_numbers = #tpu.dot_dimension_numbers<[1], [0], [0], [1], [0, 0, 1, 1], [], []>} : vector<16x64xf32>, vector<64x32xf32>, vector<16x32xf32> -> vector<16x32xf32>
    %c11 = arith.constant 11 : index
    %c0_58 = arith.constant 0 : index
    %297 = vector.load %arg2[%c11, %c0_58] : memref<24x128xf32, #tpu.memory_space<vmem>>, vector<1x32xf32>
    %298 = vector.broadcast %297 : vector<1x32xf32> to vector<16x32xf32>
    %299 = arith.addf %296, %298 : vector<16x32xf32>
    %300 = arith.addf %287, %299 : vector<16x32xf32>
    %c14 = arith.constant 14 : index
    %c0_59 = arith.constant 0 : index
    %301 = vector.load %arg2[%c14, %c0_59] : memref<24x128xf32, #tpu.memory_space<vmem>>, vector<1x32xf32>
    %c15 = arith.constant 15 : index
    %c0_60 = arith.constant 0 : index
    %302 = vector.load %arg2[%c15, %c0_60] : memref<24x128xf32, #tpu.memory_space<vmem>>, vector<1x32xf32>
    %cst_61 = arith.constant dense<0.000000e+00> : vector<16xf32>
    %303 = vector.multi_reduction <add>, %300, %cst_61 [1] : vector<16x32xf32> to vector<16xf32>
    %304 = vector.shape_cast %303 : vector<16xf32> to vector<16x1xf32>
    %cst_62 = arith.constant 3.200000e+01 : f32
    %305 = vector.broadcast %cst_62 : f32 to vector<16x1xf32>
    %306 = arith.divf %304, %305 : vector<16x1xf32>
    %307 = vector.broadcast %306 : vector<16x1xf32> to vector<16x32xf32>
    %308 = arith.subf %300, %307 : vector<16x32xf32>
    %309 = arith.mulf %308, %308 : vector<16x32xf32>
    %cst_63 = arith.constant dense<0.000000e+00> : vector<16xf32>
    %310 = vector.multi_reduction <add>, %309, %cst_63 [1] : vector<16x32xf32> to vector<16xf32>
    %311 = vector.shape_cast %310 : vector<16xf32> to vector<16x1xf32>
    %cst_64 = arith.constant 3.200000e+01 : f32
    %312 = vector.broadcast %cst_64 : f32 to vector<16x1xf32>
    %313 = arith.divf %311, %312 : vector<16x1xf32>
    %314 = vector.broadcast %306 : vector<16x1xf32> to vector<16x32xf32>
    %315 = arith.subf %300, %314 : vector<16x32xf32>
    %cst_65 = arith.constant 9.99999974E-6 : f32
    %316 = vector.broadcast %cst_65 : f32 to vector<16x1xf32>
    %317 = arith.addf %313, %316 : vector<16x1xf32>
    %318 = math.rsqrt %317 : vector<16x1xf32>
    %319 = vector.broadcast %318 : vector<16x1xf32> to vector<16x32xf32>
    %320 = arith.mulf %315, %319 : vector<16x32xf32>
    %321 = vector.broadcast %301 : vector<1x32xf32> to vector<16x32xf32>
    %322 = arith.mulf %320, %321 : vector<16x32xf32>
    %323 = vector.broadcast %302 : vector<1x32xf32> to vector<16x32xf32>
    %324 = arith.addf %322, %323 : vector<16x32xf32>
    %c400 = arith.constant 400 : index
    %c0_66 = arith.constant 0 : index
    %325 = vector.load %arg1[%c400, %c0_66] : memref<432x128xf32, #tpu.memory_space<vmem>>, vector<32x128xf32>
    %cst_67 = arith.constant dense<0.000000e+00> : vector<16x128xf32>
    %326 = tpu.matmul %324, %325, %cst_67 {dimension_numbers = #tpu.dot_dimension_numbers<[1], [0], [0], [1], [0, 0, 1, 1], [], []>} : vector<16x32xf32>, vector<32x128xf32>, vector<16x128xf32> -> vector<16x128xf32>
    %c16 = arith.constant 16 : index
    %c0_68 = arith.constant 0 : index
    %327 = vector.load %arg2[%c16, %c0_68] : memref<24x128xf32, #tpu.memory_space<vmem>>, vector<1x128xf32>
    %328 = vector.broadcast %327 : vector<1x128xf32> to vector<16x128xf32>
    %329 = arith.addf %326, %328 : vector<16x128xf32>
    %c0_69 = arith.constant 0 : index
    %c0_70 = arith.constant 0 : index
    %330 = vector.load %arg3[%c0_69, %c0_70] : memref<16x128xf32, #tpu.memory_space<vmem>>, vector<16x128xf32>
    tpu.vector_store %arg3[%c0_69, %c0_70], %329 {strides = array<i32>} : memref<16x128xf32, #tpu.memory_space<vmem>>, vector<16x128xf32>,
    %331 = tpu.concatenate %72, %74, %76, %78, %80, %82, %84, %86, %228, %230, %232, %234, %236, %238, %240, %242 in 1 : vector<8x8xf32>, vector<8x8xf32>, vector<8x8xf32>, vector<8x8xf32>, vector<8x8xf32>, vector<8x8xf32>, vector<8x8xf32>, vector<8x8xf32>, vector<8x8xf32>, vector<8x8xf32>, vector<8x8xf32>, vector<8x8xf32>, vector<8x8xf32>, vector<8x8xf32>, vector<8x8xf32>, vector<8x8xf32> -> vector<8x128xf32>
    %c0_71 = arith.constant 0 : index
    %c0_72 = arith.constant 0 : index
    %332 = vector.load %arg4[%c0_71, %c0_72] : memref<8x128xf32, #tpu.memory_space<vmem>>, vector<8x128xf32>
    tpu.vector_store %arg4[%c0_71, %c0_72], %331 {strides = array<i32>} : memref<8x128xf32, #tpu.memory_space<vmem>>, vector<8x128xf32>,
    return
  }
}

</mosaic_0001>

<bundles_post_ra>
// kernel: model_forward.1
= control target key start
LH: loop header
LB: loop body
LE: loop exit
PB: predicated region body
PF: predicated region fallthrough
CT: control target
= control target key end

     0   :  { %10 = vsyncpa [#allocation3], 0  ;;  %s5297_s0 = inlined_call_operand.vmem [shape: s32[16,1], index: 0, kind: input, shape index: {}]   ;;  %s5298_s1 = inlined_call_operand.hbm [shape: f32[432,128], index: 1, kind: input, shape index: {}]   ;;  %s5299_s2 = inlined_call_operand.hbm [shape: f32[24,128], index: 2, kind: input, shape index: {}]   ;;  %s5300_s3 = inlined_call_operand.vmem [shape: f32[16,128], index: 3, kind: output, shape index: {0}]   ;;  %s5301_s4 = inlined_call_operand.vmem [shape: f32[8,128], index: 4, kind: output, shape index: {1}]  }
   0x1   :  { %11 = vsyncpa [#allocation5], 0  ;;  %s4716_s15 = smov [#allocation2]   ;;  %s4668_s19 = scalar_lea.hbm %s5298_s1, 6912 }
   0x2   :  { %s19_s16 = sshll.u32 %s4716_s15, 4  ;;  %p4669_p0 = scmp.ne.s32.totalorder %s5298_s1, %s4668_s19  ;;  %s20_s16 = int_to_ptr.vmem [resolvable:$true] %s19_s16 }
   0x3   :  { %p4672_p1 = scmp.lt.u32.totalorder %s4668_s19, %s5298_s1 }
   0x5   :  { %p4674_p2 = pnand %p4672_p1, %p4669_p0 }
   0x7   :  { %4677 = shalt.err (!%p4674_p2)
}
   0x8   :  { %s4678_s24 = scalar_lea.vmem %s20_s16, 6912  ;;  %p4683_p4 = scmp.lt.s32.totalorder %s20_s16, %s20_s16 }
   0x9   :  { %p4679_p3 = scmp.ne.s32.totalorder %s20_s16, %s4678_s24  ;;  %p4684_p5 = scmp.lt.s32.totalorder %s4678_s24, %s4678_s24 }
   0xb   :  { %p4685_p6 = por %p4684_p5, %p4683_p4 }
   0xd   :  { %p4686_p7 = pnand %p4685_p6, %p4679_p3 }
   0xf   :  { %4689 = shalt.err (!%p4686_p7)
}
  0x10   :  { %s4717_s25 = smov 128   ;;  %s4718_s26 = smov 8  }
  0x11   :  { %25 = dma.hbm_to_vmem [thread:$0]  %s5298_s1, 6912, %s20_s16, [#allocation3], %s4717_s25, %s4717_s25, %s4718_s26  }
  0x12   :  { %s4719_s29 = smov [#allocation4]   ;;  %s4690_s7 = scalar_lea.hbm %s5299_s2, 384 }
  0x13   :  { %s31_s30 = sshll.u32 %s4719_s29, 4  ;;  %p4691_p8 = scmp.ne.s32.totalorder %s5299_s2, %s4690_s7  ;;  %s32_s30 = int_to_ptr.vmem [resolvable:$true] %s31_s30 }
  0x14   :  { %p4694_p9 = scmp.lt.u32.totalorder %s4690_s7, %s5299_s2 }
  0x16   :  { %p4696_p10 = pnand %p4694_p9, %p4691_p8 }
  0x18   :  { %4699 = shalt.err (!%p4696_p10)
}
  0x19   :  { %s4700_s12 = scalar_lea.vmem %s32_s30, 384  ;;  %p4705_p12 = scmp.lt.s32.totalorder %s32_s30, %s32_s30 }
  0x1a   :  { %p4701_p11 = scmp.ne.s32.totalorder %s32_s30, %s4700_s12  ;;  %p4706_p13 = scmp.lt.s32.totalorder %s4700_s12, %s4700_s12 }
  0x1c   :  { %p4707_p0 = por %p4706_p13, %p4705_p12 }
  0x1e   :  { %p4708_p1 = pnand %p4707_p0, %p4701_p11 }
  0x20   :  { %4711 = shalt.err (!%p4708_p1)
}
  0x21   :  { %37 = dma.hbm_to_vmem [thread:$0]  %s5299_s2, 384, %s32_s30, [#allocation5], %s4717_s25, %s4717_s25, %s4718_s26  }
  0x22   :  { %4712 = dma.done.wait [#allocation3], 6912  }
  0x23   :  { %4713 = vsyncadd [#allocation3], 4294960384 }
  0x24   :  { %4714 = dma.done.wait [#allocation5], 384  }
  0x25   :  { %4715 = vsyncadd [#allocation5], 4294966912  ;;  %v4720_v0 = vmov 0   ;;  %v44_v1 = vld [vmem:[%s5297_s0] sm:$0xff]  ;;  %v69_v2 = vld [vmem:[#allocation2] sm:$0xff]  ;;  %v4721_v24 = vmov 0.0   ;;  %v46_v25 = vlaneseq }
  0x26   :  { %4587 = vset.pattern.permute.xlu0 %v4720_v0  ;;  %v70_v3 = vld [vmem:[#allocation2 + $0x8] sm:$0xff]  ;;  %v71_v4 = vld [vmem:[#allocation2 + $0x10] sm:$0xff]  ;;  %v72_v5 = vld [vmem:[#allocation2 + $0x18] sm:$0xff]  ;;  %vm79_vm2 = vcmask 654336   ;;  %vm170_vm7 = vcmask 261120   ;;  %vm4722_vm8 = vmmov 0  }
  0x27   :  { %52 = vperm.xlu0 %4587, %v44_v1   ;;  %v45_v6 = vld [vmem:[%s5297_s0 + $0x8] sm:$0xff]  ;;  %v4458_v7 = vpack.c.bf16 %v70_v3, %v69_v2  ;;  %v4462_v8 = vpack.c.bf16 %v72_v5, %v71_v4  ;;  %v74_v10 = vld [vmem:[#allocation2 + $0x28] sm:$0xff]  ;;  %v75_v12 = vld [vmem:[#allocation2 + $0x30] sm:$0xff]  ;;  %v49_v26 = vshrl.u32 %v46_v25, 7  ;;  %v47_v27 = vand.u32 127, %v46_v25  ;;  %s4723_s0 = smov 104  }
  0x28   :  { %v73_v9 = vld [vmem:[#allocation2 + $0x20] sm:$0xff]  ;;  %v76_v13 = vld [vmem:[#allocation2 + $0x38] sm:$0xff]  ;;  %v161_v14 = vld [vmem:[#allocation2 + $0x50] sm:$0xff]  ;;  %s4724_s2 = smov 120   ;;  %s4725_s18 = smov 112   ;;  %vm268_vm9 = vcmask 64512  }
  0x29   :  { %4459 = vmatprep.subr.bf16.mxu0 %v4458_v7  ;;  %v4466_v11 = vpack.c.bf16 %v74_v10, %v73_v9  ;;  %v162_v15 = vld [vmem:[#allocation2 + $0x58] sm:$0xff]  ;;  %v163_v16 = vld [vmem:[#allocation2 + $0x60] sm:$0xff]  ;;  %v164_v18 = vld [vmem:[#allocation2 + $0x68] sm:$0xff]  ;;  %v4470_v19 = vpack.c.bf16 %v76_v13, %v75_v12  ;;  %v59_v28 = vadd.s32 64, %v49_v26  ;;  %v50_v29 = vadd.s32 8, %v49_v26  ;;  %s4726_s19 = smov 96  }
  0x2a   :  { %4461 = vmatpush3.bf16.msra.mxu0 %v4458_v7  ;;  %v4478_v17 = vpack.c.bf16 %v162_v15, %v161_v14  ;;  %v4482_v20 = vpack.c.bf16 %v164_v18, %v163_v16  ;;  %v77_v21 = vld [vmem:[#allocation2 + $0x40] sm:$0xff]  ;;  %v78_v22 = vld [vmem:[#allocation2 + $0x48] sm:$0xff]  ;;  %v3939_v37 = vld [vmem:[#allocation4] ss:$0 sm:$0xff]  ;;  %s4727_s20 = smov 64   ;;  %s4728_s21 = smov 16  }
  0x2b   :  { %55 = vperm.xlu0 %4587, %v45_v6   ;;  %4463 = vmatprep.subr.bf16.mxu0 %v4462_v8  ;;  %v4474_v23 = vpack.c.bf16 %v78_v22, %v77_v21  ;;  %vm61_vm0 = vcmp.eq.s32.totalorder %v47_v27, %v59_v28  ;;  %v60_v30 = vadd.s32 64, %v50_v29  ;;  %s4729_s22 = smov 24   ;;  %vm1597_vm10 = vcmask 130048   ;;  %s4730_s23 = smov 40  }
  0x2c   :  { %4479 = vmatprep.subr.bf16.mxu1 %v4478_v17  ;;  %vm1600_vm11 = vcmask 195584   ;;  %vm1841_vm12 = vcmask 523264   ;;  %s4731_s24 = smov 32   ;;  %s4732_s25 = smov 56   ;;  %vm3904_vm13 = vcmask 326656   ;;  %vm3906_vm14 = vcmask 392192  }
  0x2d   :  { %4481 = vmatpush3.bf16.msra.mxu1 %v4478_v17  ;;  %vm62_vm4 = vcmp.eq.s32.totalorder %v47_v27, %v60_v30  ;;  %s4733_s27 = smov 48   ;;  %s4735_s28 = smov 88   ;;  %vm3908_vm15 = vcmask 457728  }
  0x2e   :  { %4465 = vmatpush3.bf16.msra.mxu0 %v4462_v8  ;;  %4483 = vmatprep.subr.bf16.mxu1 %v4482_v20  ;;  %s4736_s29 = smov 80  }
  0x2f   :  { %4467 = vmatprep.subr.bf16.mxu0 %v4466_v11 }
  0x31   :  { %4485 = vmatpush3.bf16.msra.mxu1 %v4482_v20 }
  0x32   :  { %4469 = vmatpush3.bf16.msra.mxu0 %v4466_v11  ;;  %4194 = vmatprep.subr.mxu1 %v4721_v24 }
  0x33   :  { %4471 = vmatprep.subr.bf16.mxu0 %v4470_v19 }
  0x36   :  { %4473 = vmatpush3.bf16.msra.mxu0 %v4470_v19 }
  0x37   :  { %4475 = vmatprep.subr.bf16.mxu0 %v4474_v23 }
  0x3a   :  { %4477 = vmatpush3.bf16.msra.mxu0 %v4474_v23 }
  0x3b   :  { %4209 = vmatprep.subr.mxu0 %v4721_v24 }
  0xa6   :  { %v53_v31 = vpop.permute.xlu0 %52 }
  0xa7   :  { %vm57_vm1 = vcmp.eq.s32.totalorder %v47_v27, %v53_v31 }
  0xa8   :  { %vm63_vm3 = vmor %vm57_vm1, %vm61_vm0  ;;  %vm3911_vm0 = vcmask 588800   ;;  %vm3914_vm1 = vcmask 719872  }
  0xa9   :  { %v3935_v32 = vsel %vm63_vm3, 1.0, %v4721_v24  ;;  %vm3916_vm3 = vcmask 785408  }
  0xaa   :  { %4180 = vmatprep.mubr.msk.f32.mxu0 %vm79_vm2, %v3935_v32  ;;  %v56_v33 = vpop.permute.xlu0 %55 }
  0xab   :  { %vm58_vm5 = vcmp.eq.s32.totalorder %v47_v27, %v56_v33 }
  0xac   :  { %vm64_vm6 = vmor %vm58_vm5, %vm62_vm4  ;;  %vm3918_vm4 = vcmask 850944   ;;  %vm3920_vm5 = vcmask 916480  }
  0xad   :  { %v3936_v34 = vsel %vm64_vm6, 1.0, %v4721_v24  ;;  %vm3922_vm6 = vcmask 982016  }
  0xae   :  { %4181 = vmatmul.mubr.msk.f32.vlgmr.msra.gmra.mrb[0].mxu0 %vm79_vm2, %v3936_v34 }
  0xaf   :  { %4211 = vmatprep.mubr.msk.f32.mxu0 %vm4722_vm8, %v4721_v24 }
 0x181   :  { %v4800_v35 = vpop.f32.mrb[0].mxu0 }
 0x182   :  { %v4802_v36 = vpop.f32.mrb[1].mxu0 }
 0x183   :  { %4191 = vmatprep.mubr.msk.f32.mxu1 %vm170_vm7, %v4802_v36 }
 0x184   :  { %4192 = vmatmul.mubr.msk.f32.vlgmr.msra.gmra.mrb[0].mxu1 %vm170_vm7, %v4800_v35 }
 0x185   :  { %4196 = vmatprep.mubr.msk.f32.mxu1 %vm4722_vm8, %v4721_v24 }
 0x257   :  { %v4193_v38 = vpop.f32.mrb[0].mxu1 }
 0x258   :  { %v243_v39 = vpop.f32.mrb[1].mxu1  ;;  %v4818_v41 = vadd.f32 %v4193_v38, %v3939_v37 }
 0x259   :  { %v4812_v40 = vadd.f32 %v3939_v37, %v243_v39 }
 0x25b   :  { %262 = vrot.lane.b32.xlu0 %v4812_v40, %s4723_s0  ;;  %254 = vrot.lane.b32.xlu1 %v4812_v40, %s4724_s2 }
 0x25f   :  { %260 = vrot.lane.b32.xlu0 %v4818_v41, %s4725_s18  ;;  %258 = vrot.lane.b32.xlu1 %v4812_v40, %s4725_s18 }
 0x263   :  { %266 = vrot.lane.b32.xlu0 %v4812_v40, %s4726_s19  ;;  %256 = vrot.lane.b32.xlu1 %v4818_v41, %s4724_s2 }
 0x267   :  { %264 = vrot.lane.b32.xlu1 %v4818_v41, %s4723_s0 }
 0x2cd   :  { %v4830_v42 = vpop.permute.xlu0 %262  ;;  %v4832_v43 = vpop.permute.xlu1 %254 }
 0x2ce   :  { %343 = vrot.lane.b32.xlu1 %v4832_v43, %s4726_s19 }
 0x2d1   :  { %v4836_v44 = vpop.permute.xlu0 %260  ;;  %v4838_v45 = vpop.permute.xlu1 %258 }
 0x2d2   :  { %495 = vrot.lane.b32.xlu1 %v4830_v42, %s4726_s19  ;;  %419 = vrot.lane.b32.xlu0 %v4838_v45, %s4726_s19 }
 0x2d5   :  { %v267_v46 = vpop.permute.xlu0 %266  ;;  %v4844_v47 = vpop.permute.xlu1 %256 }
 0x2d6   :  { %4195 = vmatpush3.xpose.msk.msra.mxu1 %vm268_vm9, %v267_v46  ;;  %571 = vrot.lane.b32.xlu0 %v4818_v41, %s4726_s19 }
 0x2d7   :  { %647 = vrot.lane.b32.xlu1 %v4844_v47, %s4726_s19  ;;  %4199 = vmatprep.subr.mxu1 %v4721_v24 }
 0x2d9   :  { %4197 = vmatmul.mubr.msk.f32.vlgmr.msra.gmra.mrb[2].mxu1 %vm268_vm9, %v4812_v40  ;;  %v4854_v48 = vpop.permute.xlu1 %264 }
 0x2da   :  { %723 = vrot.lane.b32.xlu0 %v4836_v44, %s4726_s19  ;;  %4201 = vmatprep.mubr.msk.f32.mxu1 %vm4722_vm8, %v4721_v24 }
 0x2db   :  { %799 = vrot.lane.b32.xlu1 %v4854_v48, %s4726_s19 }
 0x340   :  { %v344_v49 = vpop.permute.xlu1 %343 }
 0x341   :  { %4200 = vmatpush3.xpose.msk.msra.mxu1 %vm268_vm9, %v344_v49 }
 0x342   :  { %4204 = vmatprep.subr.mxu1 %v4721_v24 }
 0x344   :  { %v420_v50 = vpop.permute.xlu0 %419  ;;  %4202 = vmatmul.mubr.msk.f32.vlgmr.msra.gmra.mrb[4].mxu1 %vm268_vm9, %v4832_v43  ;;  %v496_v51 = vpop.permute.xlu1 %495 }
 0x345   :  { %4205 = vmatpush3.xpose.msk.msra.mxu1 %vm268_vm9, %v420_v50  ;;  %4210 = vmatpush3.xpose.msk.msra.mxu0 %vm268_vm9, %v496_v51 }
 0x346   :  { %4206 = vmatprep.mubr.msk.f32.mxu1 %vm4722_vm8, %v4721_v24  ;;  %4214 = vmatprep.subr.mxu1 %v4721_v24 }
 0x347   :  { %4219 = vmatprep.subr.mxu0 %v4721_v24 }
 0x348   :  { %v572_v52 = vpop.permute.xlu0 %571  ;;  %4207 = vmatmul.mubr.msk.f32.vlgmr.msra.gmra.mrb[6].mxu1 %vm268_vm9, %v4838_v45  ;;  %4212 = vmatmul.mubr.msk.f32.vlgmr.msra.gmra.mrb[2].mxu0 %vm268_vm9, %v4830_v42 }
 0x349   :  { %v648_v53 = vpop.permute.xlu1 %647  ;;  %4215 = vmatpush3.xpose.msk.msra.mxu1 %vm268_vm9, %v572_v52  ;;  %4216 = vmatprep.mubr.msk.f32.mxu1 %vm4722_vm8, %v4721_v24 }
 0x34a   :  { %4220 = vmatpush3.xpose.msk.msra.mxu0 %vm268_vm9, %v648_v53  ;;  %4221 = vmatprep.mubr.msk.f32.mxu0 %vm4722_vm8, %v4721_v24 }
 0x34b   :  { %4224 = vmatprep.subr.mxu1 %v4721_v24  ;;  %4229 = vmatprep.subr.mxu0 %v4721_v24 }
 0x34c   :  { %v724_v54 = vpop.permute.xlu0 %723  ;;  %4217 = vmatmul.mubr.msk.f32.vlgmr.msra.gmra.mrb[8].mxu1 %vm268_vm9, %v4818_v41 }
 0x34d   :  { %4222 = vmatmul.mubr.msk.f32.vlgmr.msra.gmra.mrb[4].mxu0 %vm268_vm9, %v4844_v47  ;;  %v800_v55 = vpop.permute.xlu1 %799  ;;  %4225 = vmatpush3.xpose.msk.msra.mxu1 %vm268_vm9, %v724_v54 }
 0x34e   :  { %4230 = vmatpush3.xpose.msk.msra.mxu0 %vm268_vm9, %v800_v55  ;;  %4226 = vmatprep.mubr.msk.f32.mxu1 %vm4722_vm8, %v4721_v24 }
 0x34f   :  { %4231 = vmatprep.mubr.msk.f32.mxu0 %vm4722_vm8, %v4721_v24  ;;  %4234 = vmatprep.subr.mxu1 %v4721_v24 }
 0x350   :  { %4227 = vmatmul.mubr.msk.f32.vlgmr.msra.gmra.mrb[10].mxu1 %vm268_vm9, %v4836_v44  ;;  %4239 = vmatprep.subr.mxu0 %v4721_v24 }
 0x351   :  { %4232 = vmatmul.mubr.msk.f32.vlgmr.msra.gmra.mrb[6].mxu0 %vm268_vm9, %v4854_v48  ;;  %4236 = vmatprep.mubr.msk.f32.mxu1 %vm4722_vm8, %v4721_v24 }
 0x352   :  { %4241 = vmatprep.mubr.msk.f32.mxu0 %vm4722_vm8, %v4721_v24 }
 0x3ac   :  { %v339_v56 = vpop.f32.mrb[2].mxu1 }
 0x3ad   :  { %v4198_v57 = vpop.f32.mrb[3].mxu1  ;;  %v875_v58 = vsel %vm268_vm9, %v339_v56, -inf }
 0x3ae   :  { %876 = vmax.xlane.f32.xlu0 %v875_v58 }
 0x417   :  { %v415_v59 = vpop.f32.mrb[4].mxu1 }
 0x418   :  { %v4203_v60 = vpop.f32.mrb[5].mxu1  ;;  %v878_v61 = vsel %vm268_vm9, %v415_v59, -inf }
 0x419   :  { %879 = vmax.xlane.f32.xlu1 %v878_v61 }
 0x41b   :  { %v491_v62 = vpop.f32.mrb[6].mxu1  ;;  %v567_v63 = vpop.f32.mrb[2].mxu0 }
 0x41c   :  { %v4208_v0 = vpop.f32.mrb[7].mxu1  ;;  %v4213_v1 = vpop.f32.mrb[3].mxu0  ;;  %v881_v2 = vsel %vm268_vm9, %v491_v62, -inf  ;;  %v884_v7 = vsel %vm268_vm9, %v567_v63, -inf }
 0x41d   :  { %882 = vmax.xlane.f32.xlu0 %v881_v2 }
 0x41f   :  { %v643_v3 = vpop.f32.mrb[8].mxu1 }
 0x420   :  { %v719_v4 = vpop.f32.mrb[4].mxu0  ;;  %v4218_v5 = vpop.f32.mrb[9].mxu1  ;;  %v887_v6 = vsel %vm268_vm9, %v643_v3, -inf }
 0x421   :  { %v4223_v8 = vpop.f32.mrb[5].mxu0  ;;  %888 = vmax.xlane.f32.xlu1 %v887_v6  ;;  %885 = vmax.xlane.f32.xlu0 %v884_v7  ;;  %v890_v13 = vsel %vm268_vm9, %v719_v4, -inf }
 0x423   :  { %v795_v9 = vpop.f32.mrb[10].mxu1 }
 0x424   :  { %v871_v10 = vpop.f32.mrb[6].mxu0  ;;  %v4228_v11 = vpop.f32.mrb[11].mxu1  ;;  %v893_v12 = vsel %vm268_vm9, %v795_v9, -inf }
 0x425   :  { %v4233_v14 = vpop.f32.mrb[7].mxu0  ;;  %894 = vmax.xlane.f32.xlu1 %v893_v12  ;;  %891 = vmax.xlane.f32.xlu0 %v890_v13  ;;  %v896_v15 = vsel %vm268_vm9, %v871_v10, -inf }
 0x429   :  { %897 = vmax.xlane.f32.xlu0 %v896_v15 }
 0x436   :  { %963 = vrot.lane.b32.xlu1 %v4812_v40, %s4727_s20 }
 0x43a   :  { %1115 = vrot.lane.b32.xlu1 %v4838_v45, %s4727_s20 }
 0x43b   :  { %v877_v16 = vpop.xlane.xlu0 %876 }
 0x43c   :  { %v899_v17 = vsub.f32 %v339_v56, %v877_v16 }
 0x43e   :  { %1191 = vrot.lane.b32.xlu1 %v4830_v42, %s4727_s20  ;;  %v907_v18 = vmul.f32 1.442695, %v899_v17 }
 0x43f   :  { %1039 = vrot.lane.b32.xlu0 %v4832_v43, %s4727_s20 }
 0x440   :  { %4588 = vpow2.f32 %v907_v18 }
 0x442   :  { %1343 = vrot.lane.b32.xlu1 %v4844_v47, %s4727_s20 }
 0x443   :  { %1267 = vrot.lane.b32.xlu0 %v4818_v41, %s4727_s20 }
 0x44a   :  { %v4924_v19 = vpop.eup %4588 }
 0x44b   :  { %v923_v20 = vsel %vm268_vm9, %v4924_v19, 0.0 }
 0x466   :  { %924 = vadd.xlane.f32.xlu1 %v923_v20 }
 0x4a6   :  { %v880_v21 = vpop.xlane.xlu1 %879 }
 0x4a7   :  { %v900_v22 = vsub.f32 %v415_v59, %v880_v21 }
 0x4a9   :  { %v909_v23 = vmul.f32 1.442695, %v900_v22 }
 0x4aa   :  { %v883_v25 = vpop.xlane.xlu0 %882 }
 0x4ab   :  { %4590 = vpow2.f32 %v909_v23  ;;  %v901_v26 = vsub.f32 %v491_v62, %v883_v25 }
 0x4ad   :  { %v911_v27 = vmul.f32 1.442695, %v901_v26 }
 0x4ae   :  { %v886_v28 = vpop.xlane.xlu0 %885  ;;  %v889_v29 = vpop.xlane.xlu1 %888 }
 0x4af   :  { %4592 = vpow2.f32 %v911_v27  ;;  %v902_v30 = vsub.f32 %v567_v63, %v886_v28  ;;  %v903_v31 = vsub.f32 %v643_v3, %v889_v29 }
 0x4b1   :  { %v913_v32 = vmul.f32 1.442695, %v902_v30  ;;  %v915_v33 = vmul.f32 1.442695, %v903_v31  ;;  %v1603_v31 = vld [vmem:[#allocation2 + $0x70] sm:$0xff] }
 0x4b2   :  { %v892_v34 = vpop.xlane.xlu0 %891  ;;  %v895_v37 = vpop.xlane.xlu1 %894 }
 0x4b3   :  { %4594 = vpow2.f32 %v913_v32  ;;  %v904_v38 = vsub.f32 %v719_v4, %v892_v34  ;;  %v905_v39 = vsub.f32 %v795_v9, %v895_v37  ;;  %v1604_v32 = vld [vmem:[#allocation2 + $0x78] sm:$0xff] }
 0x4b4   :  { %4596 = vpow2.f32 %v915_v33  ;;  %v4486_v34 = vpack.c.bf16 %v1604_v32, %v1603_v31  ;;  %v1828_v32 = vld [vmem:[#allocation2 + $0xb0] sm:$0xff] }
 0x4b5   :  { %v4591_v40 = vpop.eup %4590  ;;  %v917_v41 = vmul.f32 1.442695, %v904_v38  ;;  %v919_v42 = vmul.f32 1.442695, %v905_v39  ;;  %v1605_v38 = vld [vmem:[#allocation2 + $0x80] sm:$0xff]  ;;  %v1606_v39 = vld [vmem:[#allocation2 + $0x88] sm:$0xff] }
 0x4b6   :  { %v898_v43 = vpop.xlane.xlu0 %897  ;;  %v964_v45 = vpop.permute.xlu1 %963  ;;  %v926_v46 = vsel %vm268_vm9, %v4591_v40, 0.0 }
 0x4b7   :  { %4598 = vpow2.f32 %v917_v41  ;;  %v906_v47 = vsub.f32 %v871_v10, %v898_v43  ;;  %927 = vadd.xlane.f32.xlu0 %v926_v46  ;;  %4235 = vmatpush3.msra.mxu1 %v964_v45  ;;  %v4490_v41 = vpack.c.bf16 %v1606_v39, %v1605_v38  ;;  %v1831_v38 = vld [vmem:[#allocation2 + $0xc8] sm:$0xff] }
 0x4b8   :  { %4600 = vpow2.f32 %v919_v42  ;;  %4244 = vmatprep.subr.mxu1 %v4721_v24 }
 0x4b9   :  { %v4593_v49 = vpop.eup %4592  ;;  %v921_v50 = vmul.f32 1.442695, %v906_v47 }
 0x4ba   :  { %v1040_v51 = vpop.permute.xlu0 %1039  ;;  %v929_v52 = vsel %vm268_vm9, %v4593_v49, 0.0  ;;  %v1116_v63 = vpop.permute.xlu1 %1115 }
 0x4bb   :  { %4602 = vpow2.f32 %v921_v50  ;;  %930 = vadd.xlane.f32.xlu1 %v929_v52  ;;  %4240 = vmatpush3.msra.mxu0 %v1040_v51 }
 0x4bc   :  { %4249 = vmatprep.subr.mxu0 %v4721_v24 }
 0x4bd   :  { %v4595_v53 = vpop.eup %4594 }
 0x4be   :  { %v4597_v54 = vpop.eup %4596  ;;  %v932_v55 = vsel %vm268_vm9, %v4595_v53, 0.0  ;;  %v1192_v0 = vpop.permute.xlu1 %1191 }
 0x4bf   :  { %933 = vadd.xlane.f32.xlu0 %v932_v55  ;;  %v935_v56 = vsel %vm268_vm9, %v4597_v54, 0.0 }
 0x4c0   :  { %936 = vadd.xlane.f32.xlu1 %v935_v56 }
 0x4c1   :  { %v4599_v57 = vpop.eup %4598 }
 0x4c2   :  { %v4601_v58 = vpop.eup %4600  ;;  %v938_v59 = vsel %vm268_vm9, %v4599_v57, 0.0  ;;  %v1344_v1 = vpop.permute.xlu1 %1343 }
 0x4c3   :  { %939 = vadd.xlane.f32.xlu0 %v938_v59  ;;  %v941_v60 = vsel %vm268_vm9, %v4601_v58, 0.0 }
 0x4c4   :  { %942 = vadd.xlane.f32.xlu1 %v941_v60 }
 0x4c5   :  { %v4936_v61 = vpop.eup %4602 }
 0x4c6   :  { %v944_v62 = vsel %vm268_vm9, %v4936_v61, 0.0 }
 0x4c7   :  { %945 = vadd.xlane.f32.xlu0 %v944_v62 }
 0x4d5   :  { %1495 = vrot.lane.b32.xlu1 %v4854_v48, %s4727_s20  ;;  %v1268_v48 = vpop.permute.xlu0 %1267 }
 0x4dd   :  { %1419 = vrot.lane.b32.xlu0 %v4836_v44, %s4727_s20 }
 0x4f3   :  { %v925_v2 = vpop.xlane.xlu1 %924 }
 0x4f4   :  { %4604 = vrcp.f32 %v925_v2  ;;  %v3966_v2 = vld [vmem:[#allocation4 + $0x1] ss:$0 sm:$0xff] }
 0x4fe   :  { %v4605_v3 = vpop.eup %4604 }
 0x4ff   :  { %v4945_v4 = vmul.f32 %v4605_v3, %v4924_v19 }
 0x501   :  { %4237 = vmatmul.mubr.msk.f32.vlgmr.msra.gmra.mrb[12].mxu1 %vm268_vm9, %v4945_v4 }
 0x502   :  { %4245 = vmatpush3.msra.mxu1 %v1116_v63  ;;  %4246 = vmatprep.mubr.msk.f32.mxu1 %vm4722_vm8, %v4721_v24 }
 0x503   :  { %4254 = vmatprep.subr.mxu1 %v4721_v24 }
 0x544   :  { %v928_v44 = vpop.xlane.xlu0 %927 }
 0x545   :  { %4606 = vrcp.f32 %v928_v44 }
 0x548   :  { %v931_v5 = vpop.xlane.xlu1 %930 }
 0x549   :  { %4608 = vrcp.f32 %v931_v5 }
 0x54c   :  { %v934_v6 = vpop.xlane.xlu0 %933 }
 0x54d   :  { %4610 = vrcp.f32 %v934_v6  ;;  %v937_v7 = vpop.xlane.xlu1 %936 }
 0x54e   :  { %4612 = vrcp.f32 %v937_v7 }
 0x54f   :  { %v4607_v8 = vpop.eup %4606 }
 0x550   :  { %v4952_v9 = vmul.f32 %v4607_v8, %v4591_v40  ;;  %v940_v10 = vpop.xlane.xlu0 %939 }
 0x551   :  { %4614 = vrcp.f32 %v940_v10  ;;  %v943_v11 = vpop.xlane.xlu1 %942 }
 0x552   :  { %4616 = vrcp.f32 %v943_v11  ;;  %4242 = vmatmul.mubr.msk.f32.vlgmr.msra.gmra.mrb[8].mxu0 %vm268_vm9, %v4952_v9 }
 0x553   :  { %v4609_v12 = vpop.eup %4608  ;;  %4250 = vmatpush3.msra.mxu0 %v1192_v0  ;;  %4251 = vmatprep.mubr.msk.f32.mxu0 %vm4722_vm8, %v4721_v24 }
 0x554   :  { %v4958_v13 = vmul.f32 %v4609_v12, %v4593_v49  ;;  %v946_v14 = vpop.xlane.xlu0 %945  ;;  %4259 = vmatprep.subr.mxu0 %v4721_v24 }
 0x555   :  { %4618 = vrcp.f32 %v946_v14  ;;  %v1496_v25 = vpop.permute.xlu1 %1495 }
 0x556   :  { %4247 = vmatmul.mubr.msk.f32.vlgmr.msra.gmra.mrb[14].mxu1 %vm268_vm9, %v4958_v13 }
 0x557   :  { %v4611_v15 = vpop.eup %4610  ;;  %4255 = vmatpush3.msra.mxu1 %v1268_v48  ;;  %4256 = vmatprep.mubr.msk.f32.mxu1 %vm4722_vm8, %v4721_v24 }
 0x558   :  { %v4613_v16 = vpop.eup %4612  ;;  %v4965_v17 = vmul.f32 %v4611_v15, %v4595_v53  ;;  %4264 = vmatprep.subr.mxu1 %v4721_v24  ;;  %v1420_v19 = vpop.permute.xlu0 %1419 }
 0x559   :  { %v4968_v18 = vmul.f32 %v4613_v16, %v4597_v54 }
 0x55a   :  { %4252 = vmatmul.mubr.msk.f32.vlgmr.msra.gmra.mrb[10].mxu0 %vm268_vm9, %v4965_v17 }
 0x55b   :  { %v4615_v20 = vpop.eup %4614  ;;  %4257 = vmatmul.mubr.msk.f32.vlgmr.msra.gmra.mrb[16].mxu1 %vm268_vm9, %v4968_v18  ;;  %4260 = vmatpush3.msra.mxu0 %v1344_v1 }
 0x55c   :  { %v4617_v21 = vpop.eup %4616  ;;  %v4974_v22 = vmul.f32 %v4615_v20, %v4599_v57  ;;  %4265 = vmatpush3.msra.mxu1 %v1420_v19  ;;  %4261 = vmatprep.mubr.msk.f32.mxu0 %vm4722_vm8, %v4721_v24 }
 0x55d   :  { %v4978_v23 = vmul.f32 %v4617_v21, %v4601_v58  ;;  %4266 = vmatprep.mubr.msk.f32.mxu1 %vm4722_vm8, %v4721_v24  ;;  %4269 = vmatprep.subr.mxu0 %v4721_v24 }
 0x55e   :  { %4262 = vmatmul.mubr.msk.f32.vlgmr.msra.gmra.mrb[12].mxu0 %vm268_vm9, %v4974_v22  ;;  %4487 = vmatprep.subr.bf16.mxu1 %v4486_v34 }
 0x55f   :  { %v4619_v26 = vpop.eup %4618  ;;  %4267 = vmatmul.mubr.msk.f32.vlgmr.msra.gmra.mrb[18].mxu1 %vm268_vm9, %v4978_v23  ;;  %4270 = vmatpush3.msra.mxu0 %v1496_v25 }
 0x560   :  { %v4988_v27 = vmul.f32 %v4619_v26, %v4936_v61  ;;  %4271 = vmatprep.mubr.msk.f32.mxu0 %vm4722_vm8, %v4721_v24  ;;  %4489 = vmatpush3.bf16.msra.mxu1 %v4486_v34  ;;  %v1737_v26 = vld [vmem:[#allocation2 + $0x98] sm:$0xff]  ;;  %v1830_v34 = vld [vmem:[#allocation2 + $0xc0] sm:$0xff] }
 0x561   :  { %4491 = vmatprep.subr.bf16.mxu1 %v4490_v41  ;;  %v4506_v39 = vpack.c.bf16 %v1831_v38, %v1830_v34  ;;  %v1967_v34 = vld [vmem:[#allocation2 + $0x100] sm:$0xff] }
 0x562   :  { %4272 = vmatmul.mubr.msk.f32.vlgmr.msra.gmra.mrb[14].mxu0 %vm268_vm9, %v4988_v27 }
 0x564   :  { %4493 = vmatpush3.bf16.msra.mxu1 %v4490_v41  ;;  %v1833_v41 = vld [vmem:[#allocation2 + $0xd8] sm:$0xff] }
 0x5d4   :  { %v1035_v28 = vpop.f32.mrb[12].mxu1 }
 0x5d5   :  { %v4238_v29 = vpop.f32.mrb[13].mxu1 }
 0x5d6   :  { %v1738_v29 = vld [vmem:[#allocation2 + $0xa0] sm:$0xff] }
 0x625   :  { %v1111_v30 = vpop.f32.mrb[8].mxu0 }
 0x626   :  { %1573 = vrot.lane.b32.xlu0 %v1111_v30, %s4718_s26  ;;  %v4243_v33 = vpop.f32.mrb[9].mxu0  ;;  %v1739_v30 = vld [vmem:[#allocation2 + $0xa8] sm:$0xff] }
 0x627   :  { %v4498_v31 = vpack.c.bf16 %v1739_v30, %v1738_v29  ;;  %v1829_v33 = vld [vmem:[#allocation2 + $0xb8] sm:$0xff] }
 0x629   :  { %v1187_v37 = vpop.f32.mrb[14].mxu1 }
 0x62a   :  { %1581 = vrot.lane.b32.xlu0 %v1187_v37, %s4728_s21  ;;  %v4248_v40 = vpop.f32.mrb[15].mxu1  ;;  %v4502_v37 = vpack.c.bf16 %v1829_v33, %v1828_v32  ;;  %v1966_v32 = vld [vmem:[#allocation2 + $0xf8] sm:$0xff] }
 0x62b   :  { %v1832_v40 = vld [vmem:[#allocation2 + $0xd0] sm:$0xff] }
 0x62c   :  { %4503 = vmatprep.subr.bf16.mxu1 %v4502_v37 }
 0x62d   :  { %v1263_v42 = vpop.f32.mrb[10].mxu0 }
 0x62e   :  { %v1339_v43 = vpop.f32.mrb[16].mxu1  ;;  %v4253_v45 = vpop.f32.mrb[11].mxu0  ;;  %1589 = vrot.lane.b32.xlu0 %v1263_v42, %s4729_s22  ;;  %v4510_v42 = vpack.c.bf16 %v1833_v41, %v1832_v40 }
 0x62f   :  { %v4258_v46 = vpop.f32.mrb[17].mxu1 }
 0x631   :  { %v1415_v47 = vpop.f32.mrb[12].mxu0 }
 0x632   :  { %v1491_v49 = vpop.f32.mrb[18].mxu1  ;;  %1575 = vrot.lane.b32.xlu1 %v1415_v47, %s4718_s26  ;;  %v4263_v50 = vpop.f32.mrb[13].mxu0 }
 0x633   :  { %v4268_v51 = vpop.f32.mrb[19].mxu1 }
 0x635   :  { %v1567_v52 = vpop.f32.mrb[14].mxu0 }
 0x636   :  { %1583 = vrot.lane.b32.xlu1 %v1491_v49, %s4728_s21  ;;  %v4273_v53 = vpop.f32.mrb[15].mxu0 }
 0x63a   :  { %1591 = vrot.lane.b32.xlu1 %v1567_v52, %s4729_s22  ;;  %v3969_v52 = vld [vmem:[#allocation4 + $0x4] ss:$0 sm:$0xff] }
 0x698   :  { %v1574_v54 = vpop.permute.xlu0 %1573 }
 0x699   :  { %v1595_v56 = vsel %vm268_vm9, %v1035_v28, %v1574_v54  ;;  %v3970_v54 = vld [vmem:[#allocation4 + $0x5] ss:$0 sm:$0xff] }
 0x69c   :  { %v1582_v55 = vpop.permute.xlu0 %1581 }
 0x69d   :  { %v1598_v57 = vsel %vm1597_vm10, %v1595_v56, %v1582_v55 }
 0x6a0   :  { %v1590_v58 = vpop.permute.xlu0 %1589 }
 0x6a1   :  { %v1601_v59 = vsel %vm1600_vm11, %v1598_v57, %v1590_v58 }
 0x6a2   :  { %4282 = vmatprep.mubr.msk.f32.mxu1 %vm170_vm7, %v1601_v59 }
 0x6a4   :  { %v1576_v60 = vpop.permute.xlu1 %1575 }
 0x6a5   :  { %v1596_v62 = vsel %vm268_vm9, %v1339_v43, %v1576_v60 }
 0x6a8   :  { %v1584_v61 = vpop.permute.xlu1 %1583 }
 0x6a9   :  { %v1599_v63 = vsel %vm1597_vm10, %v1596_v62, %v1584_v61  ;;  %v1834_v61 = vld [vmem:[#allocation2 + $0xe0] sm:$0xff]  ;;  %v1835_v62 = vld [vmem:[#allocation2 + $0xe8] sm:$0xff] }
 0x6ac   :  { %v1592_v0 = vpop.permute.xlu1 %1591 }
 0x6ad   :  { %v1602_v1 = vsel %vm1600_vm11, %v1599_v63, %v1592_v0  ;;  %v4514_v63 = vpack.c.bf16 %v1835_v62, %v1834_v61  ;;  %v3971_v0 = vld [vmem:[#allocation4 + $0x2] ss:$0 sm:$0xff] }
 0x6ae   :  { %4283 = vmatmul.mubr.msk.f32.vlgmr.msra.gmra.mrb[20].mxu1 %vm170_vm7, %v1602_v1 }
 0x6af   :  { %4505 = vmatpush3.bf16.msra.mxu1 %v4502_v37  ;;  %v1968_v37 = vld [vmem:[#allocation2 + $0x108] sm:$0xff] }
 0x6b0   :  { %4507 = vmatprep.subr.bf16.mxu1 %v4506_v39  ;;  %v4522_v38 = vpack.c.bf16 %v1968_v37, %v1967_v34 }
 0x6b3   :  { %4509 = vmatpush3.bf16.msra.mxu1 %v4506_v39 }
 0x6b4   :  { %4511 = vmatprep.subr.bf16.mxu1 %v4510_v42 }
 0x6b7   :  { %4513 = vmatpush3.bf16.msra.mxu1 %v4510_v42 }
 0x6b8   :  { %4515 = vmatprep.subr.bf16.mxu1 %v4514_v63 }
 0x6bb   :  { %4517 = vmatpush3.bf16.msra.mxu1 %v4514_v63 }
 0x6bc   :  { %4336 = vmatprep.subr.mxu1 %v4721_v24 }
 0x781   :  { %v4284_v3 = vpop.f32.mrb[20].mxu1 }
 0x782   :  { %v1690_v48 = vadd.f32 %v4284_v3, %v3966_v2  ;;  %v1684_v44 = vpop.f32.mrb[21].mxu1 }
 0x783   :  { %v1685_v5 = vadd.f32 %v3966_v2, %v1684_v44 }
 0x784   :  { %v1694_v6 = vadd.f32 %v4800_v35, %v1690_v48 }
 0x785   :  { %v1693_v7 = vadd.f32 %v1685_v5, %v4802_v36  ;;  %v1736_v36 = vld [vmem:[#allocation2 + $0x90] sm:$0xff] }
 0x786   :  { %v1700_v8 = vsel %vm170_vm7, %v1694_v6, 0.0  ;;  %v4494_v28 = vpack.c.bf16 %v1737_v26, %v1736_v36 }
 0x787   :  { %1701 = vadd.xlane.f32.xlu1 %v1700_v8  ;;  %v1697_v10 = vsel %vm170_vm7, %v1693_v7, 0.0 }
 0x788   :  { %1698 = vadd.xlane.f32.xlu0 %v1697_v10  ;;  %4495 = vmatprep.subr.bf16.mxu0 %v4494_v28 }
 0x789   :  { %4497 = vmatpush3.bf16.msra.mxu0 %v4494_v28 }
 0x78a   :  { %4499 = vmatprep.subr.bf16.mxu0 %v4498_v31 }
 0x78d   :  { %4501 = vmatpush3.bf16.msra.mxu0 %v4498_v31  ;;  %v1965_v31 = vld [vmem:[#allocation2 + $0xf0] sm:$0xff] }
 0x78e   :  { %v4518_v33 = vpack.c.bf16 %v1966_v32, %v1965_v31 }
 0x790   :  { %4519 = vmatprep.subr.bf16.mxu0 %v4518_v33 }
 0x814   :  { %v1702_v11 = vpop.xlane.xlu1 %1701 }
 0x815   :  { %v1705_v12 = vmul.f32 0.03125, %v1702_v11  ;;  %v1699_v14 = vpop.xlane.xlu0 %1698 }
 0x816   :  { %v1704_v15 = vmul.f32 0.03125, %v1699_v14 }
 0x817   :  { %v1707_v16 = vsub.f32 %v1694_v6, %v1705_v12  ;;  %v3974_v6 = vld [vmem:[#allocation4 + $0x3] ss:$0 sm:$0xff] }
 0x818   :  { %v1706_v19 = vsub.f32 %v1693_v7, %v1704_v15 }
 0x819   :  { %v1709_v25 = vmul.f32 %v1707_v16, %v1707_v16 }
 0x81a   :  { %v1708_v20 = vmul.f32 %v1706_v19, %v1706_v19 }
 0x81b   :  { %v1713_v35 = vsel %vm170_vm7, %v1709_v25, 0.0 }
 0x81c   :  { %v1710_v21 = vsel %vm170_vm7, %v1708_v20, 0.0 }
 0x81d   :  { %1711 = vadd.xlane.f32.xlu0 %v1710_v21 }
 0x821   :  { %1714 = vadd.xlane.f32.xlu0 %v1713_v35 }
 0x8aa   :  { %v1712_v43 = vpop.xlane.xlu0 %1711 }
 0x8ab   :  { %v1716_v45 = vmul.f32 0.03125, %v1712_v43 }
 0x8ad   :  { %v1718_v46 = vadd.f32 1e-05, %v1716_v45 }
 0x8ae   :  { %v1715_v47 = vpop.xlane.xlu0 %1714 }
 0x8af   :  { %4620 = vrsqrt.f32 %v1718_v46  ;;  %v1717_v49 = vmul.f32 0.03125, %v1715_v47  ;;  %v3977_v47 = vld [vmem:[#allocation4 + $0x6] ss:$0 sm:$0xff] }
 0x8b1   :  { %v1719_v50 = vadd.f32 1e-05, %v1717_v49 }
 0x8b3   :  { %4622 = vrsqrt.f32 %v1719_v50 }
 0x8b9   :  { %v4621_v51 = vpop.eup %4620 }
 0x8ba   :  { %v1722_v53 = vmul.f32 %v4621_v51, %v1706_v19 }
 0x8bc   :  { %v1728_v55 = vmul.f32 %v3969_v52, %v1722_v53 }
 0x8bd   :  { %v4623_v56 = vpop.eup %4622 }
 0x8be   :  { %v1723_v57 = vmul.f32 %v4623_v56, %v1707_v16  ;;  %v1734_v58 = vadd.f32 %v3970_v54, %v1728_v55 }
 0x8c0   :  { %v1729_v59 = vmul.f32 %v3969_v52, %v1723_v57  ;;  %4293 = vmatprep.mubr.msk.f32.mxu0 %vm170_vm7, %v1734_v58  ;;  %v3978_v52 = vld [vmem:[#allocation4 + $0x7] ss:$0 sm:$0xff]  ;;  %v3979_v57 = vld [vmem:[#allocation4 + $0x8] ss:$0 sm:$0xff] }
 0x8c2   :  { %v1735_v60 = vadd.f32 %v3970_v54, %v1729_v59 }
 0x8c4   :  { %4294 = vmatmul.mubr.msk.f32.vlgmr.msra.gmra.mrb[16].mxu0 %vm170_vm7, %v1735_v60 }
 0x8c5   :  { %4521 = vmatpush3.bf16.msra.mxu0 %v4518_v33 }
 0x8c6   :  { %4523 = vmatprep.subr.bf16.mxu0 %v4522_v38 }
 0x8c9   :  { %4525 = vmatpush3.bf16.msra.mxu0 %v4522_v38 }
 0x8ca   :  { %4326 = vmatprep.subr.mxu0 %v4721_v24 }
 0x997   :  { %v4295_v1 = vpop.f32.mrb[16].mxu0 }
 0x998   :  { %v1823_v2 = vadd.f32 %v4295_v1, %v3971_v0  ;;  %v1817_v3 = vpop.f32.mrb[17].mxu0 }
 0x999   :  { %v1818_v48 = vadd.f32 %v3971_v0, %v1817_v3 }
 0x99a   :  { %v1827_v5 = vmax.f32 %v1823_v2, 0.0 }
 0x99b   :  { %v1826_v44 = vmax.f32 %v1818_v48, 0.0 }
 0x99d   :  { %4312 = vmatprep.mubr.msk.f32.mxu1 %vm1841_vm12, %v1826_v44 }
 0x99e   :  { %4313 = vmatmul.mubr.msk.f32.vlgmr.msra.gmra.mrb[22].mxu1 %vm1841_vm12, %v1827_v5 }
 0x99f   :  { %4338 = vmatprep.mubr.msk.f32.mxu1 %vm4722_vm8, %v4721_v24 }
 0xa71   :  { %v4314_v7 = vpop.f32.mrb[22].mxu1 }
 0xa72   :  { %v1920_v8 = vadd.f32 %v4314_v7, %v3974_v6  ;;  %v1914_v10 = vpop.f32.mrb[23].mxu1 }
 0xa73   :  { %v1915_v11 = vadd.f32 %v3974_v6, %v1914_v10 }
 0xa74   :  { %v1924_v12 = vadd.f32 %v1920_v8, %v1735_v60 }
 0xa75   :  { %v1923_v14 = vadd.f32 %v1915_v11, %v1734_v58 }
 0xa76   :  { %v1930_v15 = vsel %vm170_vm7, %v1924_v12, 0.0 }
 0xa77   :  { %1931 = vadd.xlane.f32.xlu0 %v1930_v15  ;;  %v1927_v16 = vsel %vm170_vm7, %v1923_v14, 0.0 }
 0xa78   :  { %1928 = vadd.xlane.f32.xlu1 %v1927_v16 }
 0xb04   :  { %v1932_v19 = vpop.xlane.xlu0 %1931 }
 0xb05   :  { %v1934_v20 = vmul.f32 0.03125, %v1932_v19  ;;  %v1929_v21 = vpop.xlane.xlu1 %1928 }
 0xb06   :  { %v1933_v25 = vmul.f32 0.03125, %v1929_v21 }
 0xb07   :  { %v1936_v35 = vsub.f32 %v1924_v12, %v1934_v20 }
 0xb08   :  { %v1935_v36 = vsub.f32 %v1923_v14, %v1933_v25 }
 0xb09   :  { %v1938_v26 = vmul.f32 %v1936_v35, %v1936_v35 }
 0xb0a   :  { %v1937_v28 = vmul.f32 %v1935_v36, %v1935_v36 }
 0xb0b   :  { %v1942_v29 = vsel %vm170_vm7, %v1938_v26, 0.0 }
 0xb0c   :  { %1943 = vadd.xlane.f32.xlu0 %v1942_v29  ;;  %v1939_v30 = vsel %vm170_vm7, %v1937_v28, 0.0 }
 0xb0d   :  { %1940 = vadd.xlane.f32.xlu1 %v1939_v30 }
 0xb99   :  { %v1944_v39 = vpop.xlane.xlu0 %1943 }
 0xb9a   :  { %v1946_v40 = vmul.f32 0.03125, %v1944_v39  ;;  %v1941_v41 = vpop.xlane.xlu1 %1940 }
 0xb9b   :  { %v1945_v42 = vmul.f32 0.03125, %v1941_v41 }
 0xb9c   :  { %v1948_v43 = vadd.f32 1e-05, %v1946_v40 }
 0xb9d   :  { %v1947_v45 = vadd.f32 1e-05, %v1945_v42 }
 0xb9e   :  { %4624 = vrsqrt.f32 %v1948_v43 }
 0xb9f   :  { %4626 = vrsqrt.f32 %v1947_v45 }
 0xba8   :  { %v4625_v46 = vpop.eup %4624 }
 0xba9   :  { %v4627_v49 = vpop.eup %4626  ;;  %v1952_v50 = vmul.f32 %v4625_v46, %v1936_v35 }
 0xbaa   :  { %v1951_v51 = vmul.f32 %v4627_v49, %v1935_v36 }
 0xbab   :  { %v1958_v53 = vmul.f32 %v3977_v47, %v1952_v50 }
 0xbac   :  { %v1957_v54 = vmul.f32 %v3977_v47, %v1951_v51 }
 0xbad   :  { %v5028_v56 = vadd.f32 %v3978_v52, %v1958_v53 }
 0xbae   :  { %v5026_v55 = vadd.f32 %v3978_v52, %v1957_v54 }
 0xbb0   :  { %4323 = vmatprep.mubr.msk.f32.mxu0 %vm170_vm7, %v5026_v55 }
 0xbb1   :  { %4324 = vmatmul.mubr.msk.f32.vlgmr.msra.gmra.mrb[18].mxu0 %vm170_vm7, %v5028_v56 }
 0xbb2   :  { %4328 = vmatprep.mubr.msk.f32.mxu0 %vm4722_vm8, %v4721_v24 }
 0xc84   :  { %v4325_v58 = vpop.f32.mrb[18].mxu0 }
 0xc85   :  { %v2046_v59 = vpop.f32.mrb[19].mxu0  ;;  %v5042_v61 = vadd.f32 %v4325_v58, %v3979_v57 }
 0xc86   :  { %v5036_v60 = vadd.f32 %v3979_v57, %v2046_v59 }
 0xc88   :  { %2061 = vrot.lane.b32.xlu0 %v5036_v60, %s4725_s18  ;;  %2057 = vrot.lane.b32.xlu1 %v5036_v60, %s4724_s2 }
 0xc8c   :  { %2063 = vrot.lane.b32.xlu0 %v5042_v61, %s4725_s18  ;;  %2065 = vrot.lane.b32.xlu1 %v5036_v60, %s4723_s0 }
 0xc90   :  { %2069 = vrot.lane.b32.xlu0 %v5036_v60, %s4726_s19  ;;  %2059 = vrot.lane.b32.xlu1 %v5042_v61, %s4724_s2 }
 0xc94   :  { %2067 = vrot.lane.b32.xlu1 %v5042_v61, %s4723_s0 }
 0xcfa   :  { %v5054_v62 = vpop.permute.xlu0 %2061  ;;  %v5056_v63 = vpop.permute.xlu1 %2057 }
 0xcfb   :  { %2221 = vrot.lane.b32.xlu0 %v5054_v62, %s4726_s19  ;;  %2145 = vrot.lane.b32.xlu1 %v5056_v63, %s4726_s19 }
 0xcfe   :  { %v5062_v0 = vpop.permute.xlu0 %2063  ;;  %v5064_v1 = vpop.permute.xlu1 %2065 }
 0xcff   :  { %2373 = vrot.lane.b32.xlu0 %v5042_v61, %s4726_s19  ;;  %2297 = vrot.lane.b32.xlu1 %v5064_v1, %s4726_s19 }
 0xd02   :  { %v2070_v2 = vpop.permute.xlu0 %2069  ;;  %v5070_v3 = vpop.permute.xlu1 %2059 }
 0xd03   :  { %2525 = vrot.lane.b32.xlu0 %v5062_v0, %s4726_s19  ;;  %4327 = vmatpush3.xpose.msk.msra.mxu0 %vm268_vm9, %v2070_v2 }
 0xd04   :  { %2449 = vrot.lane.b32.xlu1 %v5070_v3, %s4726_s19  ;;  %4331 = vmatprep.subr.mxu0 %v4721_v24 }
 0xd06   :  { %4329 = vmatmul.mubr.msk.f32.vlgmr.msra.gmra.mrb[20].mxu0 %vm268_vm9, %v5036_v60  ;;  %v5080_v48 = vpop.permute.xlu1 %2067 }
 0xd07   :  { %4333 = vmatprep.mubr.msk.f32.mxu0 %vm4722_vm8, %v4721_v24 }
 0xd08   :  { %2601 = vrot.lane.b32.xlu1 %v5080_v48, %s4726_s19 }
 0xd6d   :  { %v2222_v44 = vpop.permute.xlu0 %2221  ;;  %v2146_v5 = vpop.permute.xlu1 %2145 }
 0xd6e   :  { %4332 = vmatpush3.xpose.msk.msra.mxu0 %vm268_vm9, %v2146_v5  ;;  %4337 = vmatpush3.xpose.msk.msra.mxu1 %vm268_vm9, %v2222_v44 }
 0xd6f   :  { %4346 = vmatprep.subr.mxu1 %v4721_v24  ;;  %4341 = vmatprep.subr.mxu0 %v4721_v24 }
 0xd71   :  { %4339 = vmatmul.mubr.msk.f32.vlgmr.msra.gmra.mrb[24].mxu1 %vm268_vm9, %v5054_v62  ;;  %v2374_v6 = vpop.permute.xlu0 %2373  ;;  %4334 = vmatmul.mubr.msk.f32.vlgmr.msra.gmra.mrb[22].mxu0 %vm268_vm9, %v5056_v63  ;;  %v2298_v7 = vpop.permute.xlu1 %2297 }
 0xd72   :  { %4342 = vmatpush3.xpose.msk.msra.mxu0 %vm268_vm9, %v2298_v7  ;;  %4347 = vmatpush3.xpose.msk.msra.mxu1 %vm268_vm9, %v2374_v6 }
 0xd73   :  { %4343 = vmatprep.mubr.msk.f32.mxu0 %vm4722_vm8, %v4721_v24  ;;  %4348 = vmatprep.mubr.msk.f32.mxu1 %vm4722_vm8, %v4721_v24 }
 0xd74   :  { %4356 = vmatprep.subr.mxu1 %v4721_v24  ;;  %4351 = vmatprep.subr.mxu0 %v4721_v24 }
 0xd75   :  { %4349 = vmatmul.mubr.msk.f32.vlgmr.msra.gmra.mrb[26].mxu1 %vm268_vm9, %v5042_v61  ;;  %v2526_v8 = vpop.permute.xlu0 %2525  ;;  %4344 = vmatmul.mubr.msk.f32.vlgmr.msra.gmra.mrb[24].mxu0 %vm268_vm9, %v5064_v1 }
 0xd76   :  { %v2450_v10 = vpop.permute.xlu1 %2449  ;;  %4357 = vmatpush3.xpose.msk.msra.mxu1 %vm268_vm9, %v2526_v8  ;;  %4353 = vmatprep.mubr.msk.f32.mxu0 %vm4722_vm8, %v4721_v24 }
 0xd77   :  { %4352 = vmatpush3.xpose.msk.msra.mxu0 %vm268_vm9, %v2450_v10  ;;  %4358 = vmatprep.mubr.msk.f32.mxu1 %vm4722_vm8, %v4721_v24 }
 0xd78   :  { %4361 = vmatprep.subr.mxu0 %v4721_v24  ;;  %4366 = vmatprep.subr.mxu1 %v4721_v24 }
 0xd79   :  { %4359 = vmatmul.mubr.msk.f32.vlgmr.msra.gmra.mrb[28].mxu1 %vm268_vm9, %v5062_v0 }
 0xd7a   :  { %4354 = vmatmul.mubr.msk.f32.vlgmr.msra.gmra.mrb[26].mxu0 %vm268_vm9, %v5070_v3  ;;  %v2602_v11 = vpop.permute.xlu1 %2601  ;;  %4368 = vmatprep.mubr.msk.f32.mxu1 %vm4722_vm8, %v4721_v24 }
 0xd7b   :  { %4362 = vmatpush3.xpose.msk.msra.mxu0 %vm268_vm9, %v2602_v11  ;;  %4363 = vmatprep.mubr.msk.f32.mxu0 %vm4722_vm8, %v4721_v24 }
 0xd7c   :  { %4371 = vmatprep.subr.mxu0 %v4721_v24 }
 0xd7e   :  { %4364 = vmatmul.mubr.msk.f32.vlgmr.msra.gmra.mrb[28].mxu0 %vm268_vm9, %v5080_v48 }
 0xd7f   :  { %4373 = vmatprep.mubr.msk.f32.mxu0 %vm4722_vm8, %v4721_v24 }
 0xdd9   :  { %v2141_v12 = vpop.f32.mrb[20].mxu0 }
 0xdda   :  { %v4330_v14 = vpop.f32.mrb[21].mxu0  ;;  %v2677_v15 = vsel %vm268_vm9, %v2141_v12, -inf }
 0xddb   :  { %2678 = vmax.xlane.f32.xlu0 %v2677_v15 }
 0xe44   :  { %v2217_v16 = vpop.f32.mrb[22].mxu0  ;;  %v2293_v19 = vpop.f32.mrb[24].mxu1 }
 0xe45   :  { %v4335_v20 = vpop.f32.mrb[23].mxu0  ;;  %v4340_v21 = vpop.f32.mrb[25].mxu1  ;;  %v2683_v25 = vsel %vm268_vm9, %v2293_v19, -inf  ;;  %v2680_v35 = vsel %vm268_vm9, %v2217_v16, -inf }
 0xe46   :  { %2684 = vmax.xlane.f32.xlu0 %v2683_v25  ;;  %2681 = vmax.xlane.f32.xlu1 %v2680_v35 }
 0xe48   :  { %v2369_v36 = vpop.f32.mrb[24].mxu0  ;;  %v2445_v26 = vpop.f32.mrb[26].mxu1 }
 0xe49   :  { %v4345_v28 = vpop.f32.mrb[25].mxu0  ;;  %v4350_v29 = vpop.f32.mrb[27].mxu1  ;;  %v2689_v30 = vsel %vm268_vm9, %v2445_v26, -inf  ;;  %v2686_v31 = vsel %vm268_vm9, %v2369_v36, -inf }
 0xe4a   :  { %2690 = vmax.xlane.f32.xlu1 %v2689_v30  ;;  %2687 = vmax.xlane.f32.xlu0 %v2686_v31 }
 0xe4c   :  { %v2597_v32 = vpop.f32.mrb[28].mxu1 }
 0xe4d   :  { %v2521_v33 = vpop.f32.mrb[26].mxu0  ;;  %v4360_v34 = vpop.f32.mrb[29].mxu1  ;;  %v2695_v37 = vsel %vm268_vm9, %v2597_v32, -inf }
 0xe4e   :  { %v4355_v38 = vpop.f32.mrb[27].mxu0  ;;  %2696 = vmax.xlane.f32.xlu1 %v2695_v37  ;;  %v2692_v39 = vsel %vm268_vm9, %v2521_v33, -inf }
 0xe4f   :  { %2693 = vmax.xlane.f32.xlu0 %v2692_v39 }
 0xe51   :  { %v2673_v40 = vpop.f32.mrb[28].mxu0 }
 0xe52   :  { %v4365_v41 = vpop.f32.mrb[29].mxu0  ;;  %v2698_v42 = vsel %vm268_vm9, %v2673_v40, -inf }
 0xe53   :  { %2699 = vmax.xlane.f32.xlu0 %v2698_v42 }
 0xe5f   :  { %2765 = vrot.lane.b32.xlu1 %v5036_v60, %s4727_s20 }
 0xe63   :  { %2917 = vrot.lane.b32.xlu1 %v5054_v62, %s4727_s20 }
 0xe67   :  { %2993 = vrot.lane.b32.xlu1 %v5064_v1, %s4727_s20 }
 0xe68   :  { %v2679_v43 = vpop.xlane.xlu0 %2678 }
 0xe69   :  { %2841 = vrot.lane.b32.xlu0 %v5056_v63, %s4727_s20  ;;  %v2701_v45 = vsub.f32 %v2141_v12, %v2679_v43 }
 0xe6b   :  { %3145 = vrot.lane.b32.xlu1 %v5070_v3, %s4727_s20  ;;  %v2709_v46 = vmul.f32 1.442695, %v2701_v45 }
 0xe6d   :  { %3069 = vrot.lane.b32.xlu0 %v5042_v61, %s4727_s20  ;;  %4628 = vpow2.f32 %v2709_v46 }
 0xe77   :  { %v5148_v47 = vpop.eup %4628 }
 0xe78   :  { %v2725_v49 = vsel %vm268_vm9, %v5148_v47, 0.0 }
 0xe8f   :  { %2726 = vadd.xlane.f32.xlu1 %v2725_v49 }
 0xed3   :  { %v2685_v50 = vpop.xlane.xlu0 %2684  ;;  %v2682_v51 = vpop.xlane.xlu1 %2681 }
 0xed4   :  { %v2703_v52 = vsub.f32 %v2293_v19, %v2685_v50  ;;  %v2702_v53 = vsub.f32 %v2217_v16, %v2682_v51 }
 0xed6   :  { %v2713_v54 = vmul.f32 1.442695, %v2703_v52  ;;  %v2711_v57 = vmul.f32 1.442695, %v2702_v53 }
 0xed7   :  { %v2688_v58 = vpop.xlane.xlu0 %2687  ;;  %v2691_v59 = vpop.xlane.xlu1 %2690 }
 0xed8   :  { %4630 = vpow2.f32 %v2713_v54  ;;  %v2704_v60 = vsub.f32 %v2369_v36, %v2688_v58  ;;  %v2705_v61 = vsub.f32 %v2445_v26, %v2691_v59 }
 0xed9   :  { %4632 = vpow2.f32 %v2711_v57 }
 0xeda   :  { %v2715_v62 = vmul.f32 1.442695, %v2704_v60  ;;  %v2717_v63 = vmul.f32 1.442695, %v2705_v61 }
 0xedb   :  { %v2697_v1 = vpop.xlane.xlu1 %2696 }
 0xedc   :  { %4634 = vpow2.f32 %v2715_v62  ;;  %v2694_v2 = vpop.xlane.xlu0 %2693  ;;  %v2707_v3 = vsub.f32 %v2597_v32, %v2697_v1 }
 0xedd   :  { %4636 = vpow2.f32 %v2717_v63  ;;  %v2706_v44 = vsub.f32 %v2521_v33, %v2694_v2 }
 0xede   :  { %v2721_v5 = vmul.f32 1.442695, %v2707_v3 }
 0xedf   :  { %v2719_v6 = vmul.f32 1.442695, %v2706_v44  ;;  %v2766_v7 = vpop.permute.xlu1 %2765 }
 0xee0   :  { %4638 = vpow2.f32 %v2721_v5  ;;  %v2700_v8 = vpop.xlane.xlu0 %2699  ;;  %4367 = vmatpush3.msra.mxu1 %v2766_v7  ;;  %v3403_v5 = vld [vmem:[#allocation2 + $0x110] sm:$0xff] }
 0xee1   :  { %4640 = vpow2.f32 %v2719_v6  ;;  %v2708_v10 = vsub.f32 %v2673_v40, %v2700_v8  ;;  %4376 = vmatprep.subr.mxu1 %v4721_v24  ;;  %v3404_v6 = vld [vmem:[#allocation2 + $0x118] sm:$0xff] }
 0xee2   :  { %v4631_v11 = vpop.eup %4630  ;;  %v4526_v7 = vpack.c.bf16 %v3404_v6, %v3403_v5 }
 0xee3   :  { %v4633_v12 = vpop.eup %4632  ;;  %v2723_v14 = vmul.f32 1.442695, %v2708_v10  ;;  %v2731_v15 = vsel %vm268_vm9, %v4631_v11, 0.0  ;;  %v2918_v32 = vpop.permute.xlu1 %2917 }
 0xee4   :  { %v2842_v16 = vpop.permute.xlu0 %2841  ;;  %2732 = vadd.xlane.f32.xlu1 %v2731_v15  ;;  %v2728_v19 = vsel %vm268_vm9, %v4633_v12, 0.0 }
 0xee5   :  { %4642 = vpow2.f32 %v2723_v14  ;;  %4372 = vmatpush3.msra.mxu0 %v2842_v16  ;;  %2729 = vadd.xlane.f32.xlu0 %v2728_v19  ;;  %v3406_v14 = vld [vmem:[#allocation2 + $0x128] sm:$0xff] }
 0xee6   :  { %v4635_v20 = vpop.eup %4634  ;;  %4381 = vmatprep.subr.mxu0 %v4721_v24 }
 0xee7   :  { %v4637_v21 = vpop.eup %4636  ;;  %v2734_v25 = vsel %vm268_vm9, %v4635_v20, 0.0  ;;  %v2994_v33 = vpop.permute.xlu1 %2993 }
 0xee8   :  { %v2737_v35 = vsel %vm268_vm9, %v4637_v21, 0.0 }
 0xee9   :  { %2735 = vadd.xlane.f32.xlu0 %v2734_v25  ;;  %2738 = vadd.xlane.f32.xlu1 %v2737_v35 }
 0xeea   :  { %v4639_v36 = vpop.eup %4638 }
 0xeeb   :  { %v4641_v26 = vpop.eup %4640  ;;  %v2743_v28 = vsel %vm268_vm9, %v4639_v36, 0.0  ;;  %v3146_v34 = vpop.permute.xlu1 %3145 }
 0xeec   :  { %v2740_v29 = vsel %vm268_vm9, %v4641_v26, 0.0 }
 0xeed   :  { %2741 = vadd.xlane.f32.xlu0 %v2740_v29  ;;  %2744 = vadd.xlane.f32.xlu1 %v2743_v28 }
 0xeef   :  { %v5160_v30 = vpop.eup %4642 }
 0xef0   :  { %v2746_v31 = vsel %vm268_vm9, %v5160_v30, 0.0 }
 0xef1   :  { %2747 = vadd.xlane.f32.xlu0 %v2746_v31 }
 0xefe   :  { %3297 = vrot.lane.b32.xlu1 %v5080_v48, %s4727_s20  ;;  %v3070_v48 = vpop.permute.xlu0 %3069 }
 0xf07   :  { %3221 = vrot.lane.b32.xlu0 %v5062_v0, %s4727_s20 }
 0xf1c   :  { %v2727_v37 = vpop.xlane.xlu1 %2726 }
 0xf1d   :  { %4644 = vrcp.f32 %v2727_v37 }
 0xf27   :  { %v4645_v38 = vpop.eup %4644 }
 0xf28   :  { %v5169_v39 = vmul.f32 %v4645_v38, %v5148_v47 }
 0xf2a   :  { %4369 = vmatmul.mubr.msk.f32.vlgmr.msra.gmra.mrb[30].mxu1 %vm268_vm9, %v5169_v39 }
 0xf2b   :  { %4377 = vmatpush3.msra.mxu1 %v2918_v32  ;;  %4378 = vmatprep.mubr.msk.f32.mxu1 %vm4722_vm8, %v4721_v24 }
 0xf2c   :  { %4386 = vmatprep.subr.mxu1 %v4721_v24 }
 0xf71   :  { %v2733_v0 = vpop.xlane.xlu1 %2732 }
 0xf72   :  { %v2730_v40 = vpop.xlane.xlu0 %2729  ;;  %4646 = vrcp.f32 %v2733_v0 }
 0xf73   :  { %4648 = vrcp.f32 %v2730_v40 }
 0xf76   :  { %v2736_v41 = vpop.xlane.xlu0 %2735  ;;  %v2739_v42 = vpop.xlane.xlu1 %2738 }
 0xf77   :  { %4650 = vrcp.f32 %v2736_v41 }
 0xf78   :  { %4652 = vrcp.f32 %v2739_v42 }
 0xf7a   :  { %v2742_v43 = vpop.xlane.xlu0 %2741  ;;  %v2745_v45 = vpop.xlane.xlu1 %2744 }
 0xf7b   :  { %4654 = vrcp.f32 %v2742_v43  ;;  %v4006_v43 = vld [vmem:[#allocation4 + $0x9] ss:$0 sm:$0xff] }
 0xf7c   :  { %v4647_v46 = vpop.eup %4646  ;;  %4656 = vrcp.f32 %v2745_v45 }
 0xf7d   :  { %v4649_v47 = vpop.eup %4648  ;;  %v5176_v49 = vmul.f32 %v4647_v46, %v4631_v11 }
 0xf7e   :  { %v5178_v50 = vmul.f32 %v4649_v47, %v4633_v12  ;;  %v2748_v51 = vpop.xlane.xlu0 %2747  ;;  %v3298_v63 = vpop.permute.xlu1 %3297  ;;  %v3405_v12 = vld [vmem:[#allocation2 + $0x120] sm:$0xff] }
 0xf7f   :  { %4658 = vrcp.f32 %v2748_v51  ;;  %4379 = vmatmul.mubr.msk.f32.vlgmr.msra.gmra.mrb[32].mxu1 %vm268_vm9, %v5176_v49  ;;  %v4530_v16 = vpack.c.bf16 %v3406_v14, %v3405_v12  ;;  %v3537_v12 = vld [vmem:[#allocation2 + $0x140] sm:$0xff]  ;;  %v3538_v14 = vld [vmem:[#allocation2 + $0x148] sm:$0xff] }
 0xf80   :  { %4374 = vmatmul.mubr.msk.f32.vlgmr.msra.gmra.mrb[30].mxu0 %vm268_vm9, %v5178_v50  ;;  %4387 = vmatpush3.msra.mxu1 %v3070_v48 }
 0xf81   :  { %v4651_v52 = vpop.eup %4650  ;;  %4382 = vmatpush3.msra.mxu0 %v2994_v33  ;;  %4383 = vmatprep.mubr.msk.f32.mxu0 %vm4722_vm8, %v4721_v24 }
 0xf82   :  { %v4653_v53 = vpop.eup %4652  ;;  %v5186_v54 = vmul.f32 %v4651_v52, %v4635_v20  ;;  %4388 = vmatprep.mubr.msk.f32.mxu1 %vm4722_vm8, %v4721_v24  ;;  %4391 = vmatprep.subr.mxu0 %v4721_v24  ;;  %v3222_v58 = vpop.permute.xlu0 %3221 }
 0xf83   :  { %v5191_v57 = vmul.f32 %v4653_v53, %v4637_v21  ;;  %4396 = vmatprep.subr.mxu1 %v4721_v24 }
 0xf84   :  { %4384 = vmatmul.mubr.msk.f32.vlgmr.msra.gmra.mrb[32].mxu0 %vm268_vm9, %v5186_v54 }
 0xf85   :  { %v4655_v59 = vpop.eup %4654  ;;  %4389 = vmatmul.mubr.msk.f32.vlgmr.msra.gmra.mrb[34].mxu1 %vm268_vm9, %v5191_v57  ;;  %4392 = vmatpush3.msra.mxu0 %v3146_v34 }
 0xf86   :  { %v4657_v60 = vpop.eup %4656  ;;  %v5198_v61 = vmul.f32 %v4655_v59, %v4641_v26  ;;  %4397 = vmatpush3.msra.mxu1 %v3222_v58  ;;  %4393 = vmatprep.mubr.msk.f32.mxu0 %vm4722_vm8, %v4721_v24 }
 0xf87   :  { %v5202_v62 = vmul.f32 %v4657_v60, %v4639_v36  ;;  %4398 = vmatprep.mubr.msk.f32.mxu1 %vm4722_vm8, %v4721_v24  ;;  %4401 = vmatprep.subr.mxu0 %v4721_v24 }
 0xf88   :  { %4394 = vmatmul.mubr.msk.f32.vlgmr.msra.gmra.mrb[34].mxu0 %vm268_vm9, %v5198_v61  ;;  %4527 = vmatprep.subr.bf16.mxu1 %v4526_v7 }
 0xf89   :  { %v4659_v1 = vpop.eup %4658  ;;  %4399 = vmatmul.mubr.msk.f32.vlgmr.msra.gmra.mrb[36].mxu1 %vm268_vm9, %v5202_v62  ;;  %4402 = vmatpush3.msra.mxu0 %v3298_v63 }
 0xf8a   :  { %v5212_v2 = vmul.f32 %v4659_v1, %v5160_v30  ;;  %4403 = vmatprep.mubr.msk.f32.mxu0 %vm4722_vm8, %v4721_v24  ;;  %4529 = vmatpush3.bf16.msra.mxu1 %v4526_v7 }
 0xf8b   :  { %4531 = vmatprep.subr.bf16.mxu1 %v4530_v16 }
 0xf8c   :  { %4404 = vmatmul.mubr.msk.f32.vlgmr.msra.gmra.mrb[36].mxu0 %vm268_vm9, %v5212_v2 }
 0xf8e   :  { %4533 = vmatpush3.bf16.msra.mxu1 %v4530_v16  ;;  %v3627_v16 = vld [vmem:[#allocation2 + $0x150] sm:$0xff] }
 0xffd   :  { %v2837_v3 = vpop.f32.mrb[30].mxu1 }
 0xffe   :  { %v4370_v44 = vpop.f32.mrb[31].mxu1 }
0x1052   :  { %v2989_v8 = vpop.f32.mrb[32].mxu1 }
0x1053   :  { %v2913_v10 = vpop.f32.mrb[30].mxu0  ;;  %v4380_v11 = vpop.f32.mrb[33].mxu1 }
0x1054   :  { %3375 = vrot.lane.b32.xlu0 %v2913_v10, %s4718_s26  ;;  %v4375_v15 = vpop.f32.mrb[31].mxu0  ;;  %v3536_v10 = vld [vmem:[#allocation2 + $0x138] sm:$0xff] }
0x1055   :  { %v4538_v15 = vpack.c.bf16 %v3538_v14, %v3537_v12 }
0x1057   :  { %v3065_v24 = vpop.f32.mrb[32].mxu0 }
0x1058   :  { %v3141_v19 = vpop.f32.mrb[34].mxu1  ;;  %v4385_v20 = vpop.f32.mrb[33].mxu0  ;;  %3383 = vrot.lane.b32.xlu0 %v2989_v8, %s4728_s21 }
0x1059   :  { %v4390_v21 = vpop.f32.mrb[35].mxu1 }
0x105a   :  { %v3630_v21 = vld [vmem:[#allocation2 + $0x168] sm:$0xff] }
0x105b   :  { %v3217_v25 = vpop.f32.mrb[34].mxu0 }
0x105c   :  { %v3293_v35 = vpop.f32.mrb[36].mxu1  ;;  %3377 = vrot.lane.b32.xlu1 %v3217_v25, %s4718_s26  ;;  %v4395_v36 = vpop.f32.mrb[35].mxu0  ;;  %3391 = vrot.lane.b32.xlu0 %v3065_v24, %s4729_s22  ;;  %v3628_v24 = vld [vmem:[#allocation2 + $0x158] sm:$0xff] }
0x105d   :  { %v4400_v26 = vpop.f32.mrb[37].mxu1  ;;  %v4542_v20 = vpack.c.bf16 %v3628_v24, %v3627_v16  ;;  %v3632_v36 = vld [vmem:[#allocation2 + $0x178] sm:$0xff] }
0x105f   :  { %v3369_v28 = vpop.f32.mrb[36].mxu0  ;;  %4543 = vmatprep.subr.bf16.mxu1 %v4542_v20 }
0x1060   :  { %3385 = vrot.lane.b32.xlu1 %v3293_v35, %s4728_s21  ;;  %v4405_v29 = vpop.f32.mrb[37].mxu0  ;;  %v3631_v35 = vld [vmem:[#allocation2 + $0x170] sm:$0xff] }
0x1061   :  { %v4550_v26 = vpack.c.bf16 %v3632_v36, %v3631_v35  ;;  %v3763_v35 = vld [vmem:[#allocation2 + $0x190] sm:$0xff]  ;;  %v3764_v36 = vld [vmem:[#allocation2 + $0x198] sm:$0xff] }
0x1064   :  { %3393 = vrot.lane.b32.xlu1 %v3369_v28, %s4729_s22 }
0x10c6   :  { %v3376_v30 = vpop.permute.xlu0 %3375 }
0x10c7   :  { %v3397_v32 = vsel %vm268_vm9, %v2837_v3, %v3376_v30 }
0x10ca   :  { %v3384_v31 = vpop.permute.xlu0 %3383 }
0x10cb   :  { %v3399_v33 = vsel %vm1597_vm10, %v3397_v32, %v3384_v31 }
0x10ce   :  { %v3392_v34 = vpop.permute.xlu0 %3391  ;;  %v3378_v37 = vpop.permute.xlu1 %3377 }
0x10cf   :  { %v3401_v38 = vsel %vm1600_vm11, %v3399_v33, %v3392_v34  ;;  %v3398_v0 = vsel %vm268_vm9, %v3141_v19, %v3378_v37  ;;  %v3629_v19 = vld [vmem:[#allocation2 + $0x160] sm:$0xff]  ;;  %v4009_v37 = vld [vmem:[#allocation4 + $0xc] ss:$0 sm:$0xff] }
0x10d0   :  { %4414 = vmatprep.mubr.msk.f32.mxu1 %vm170_vm7, %v3401_v38  ;;  %v4546_v25 = vpack.c.bf16 %v3630_v21, %v3629_v19 }
0x10d2   :  { %v3386_v48 = vpop.permute.xlu1 %3385 }
0x10d3   :  { %v3400_v40 = vsel %vm1597_vm10, %v3398_v0, %v3386_v48  ;;  %v4010_v48 = vld [vmem:[#allocation4 + $0xd] ss:$0 sm:$0xff] }
0x10d6   :  { %v3394_v41 = vpop.permute.xlu1 %3393 }
0x10d7   :  { %v3402_v42 = vsel %vm1600_vm11, %v3400_v40, %v3394_v41 }
0x10d8   :  { %4415 = vmatmul.mubr.msk.f32.vlgmr.msra.gmra.mrb[38].mxu1 %vm170_vm7, %v3402_v42 }
0x10d9   :  { %4545 = vmatpush3.bf16.msra.mxu1 %v4542_v20 }
0x10da   :  { %4547 = vmatprep.subr.bf16.mxu1 %v4546_v25 }
0x10dd   :  { %4549 = vmatpush3.bf16.msra.mxu1 %v4546_v25 }
0x10de   :  { %4551 = vmatprep.subr.bf16.mxu1 %v4550_v26 }
0x10e1   :  { %4553 = vmatpush3.bf16.msra.mxu1 %v4550_v26  ;;  %v4558_v26 = vpack.c.bf16 %v3764_v36, %v3763_v35 }
0x11ab   :  { %v4416_v45 = vpop.f32.mrb[38].mxu1 }
0x11ac   :  { %v3490_v46 = vadd.f32 %v4416_v45, %v4006_v43  ;;  %v3484_v47 = vpop.f32.mrb[39].mxu1 }
0x11ad   :  { %v3485_v51 = vadd.f32 %v4006_v43, %v3484_v47  ;;  %v3634_v47 = vld [vmem:[#allocation2 + $0x188] sm:$0xff] }
0x11ae   :  { %v3494_v52 = vadd.f32 %v3490_v46, %v5028_v56  ;;  %v3633_v46 = vld [vmem:[#allocation2 + $0x180] sm:$0xff] }
0x11af   :  { %v3493_v53 = vadd.f32 %v3485_v51, %v5026_v55  ;;  %v3535_v55 = vld [vmem:[#allocation2 + $0x130] sm:$0xff]  ;;  %v4554_v51 = vpack.c.bf16 %v3634_v47, %v3633_v46 }
0x11b0   :  { %v3500_v58 = vsel %vm170_vm7, %v3494_v52, 0.0  ;;  %v4534_v11 = vpack.c.bf16 %v3536_v10, %v3535_v55 }
0x11b1   :  { %3501 = vadd.xlane.f32.xlu1 %v3500_v58  ;;  %v3497_v59 = vsel %vm170_vm7, %v3493_v53, 0.0  ;;  %4555 = vmatprep.subr.bf16.mxu1 %v4554_v51 }
0x11b2   :  { %3498 = vadd.xlane.f32.xlu0 %v3497_v59  ;;  %4535 = vmatprep.subr.bf16.mxu0 %v4534_v11 }
0x11b3   :  { %4537 = vmatpush3.bf16.msra.mxu0 %v4534_v11  ;;  %4557 = vmatpush3.bf16.msra.mxu1 %v4554_v51 }
0x11b4   :  { %4539 = vmatprep.subr.bf16.mxu0 %v4538_v15 }
0x11b7   :  { %4541 = vmatpush3.bf16.msra.mxu0 %v4538_v15 }
0x11b8   :  { %4559 = vmatprep.subr.bf16.mxu0 %v4558_v26 }
0x123e   :  { %v3502_v60 = vpop.xlane.xlu1 %3501 }
0x123f   :  { %v3504_v63 = vmul.f32 0.03125, %v3502_v60  ;;  %v3499_v1 = vpop.xlane.xlu0 %3498 }
0x1240   :  { %v3503_v3 = vmul.f32 0.03125, %v3499_v1 }
0x1241   :  { %v3506_v44 = vsub.f32 %v3494_v52, %v3504_v63  ;;  %v4011_v52 = vld [vmem:[#allocation4 + $0xa] ss:$0 sm:$0xff] }
0x1242   :  { %v3505_v5 = vsub.f32 %v3493_v53, %v3503_v3  ;;  %v4014_v3 = vld [vmem:[#allocation4 + $0xb] ss:$0 sm:$0xff] }
0x1243   :  { %v3508_v8 = vmul.f32 %v3506_v44, %v3506_v44 }
0x1244   :  { %v3507_v6 = vmul.f32 %v3505_v5, %v3505_v5 }
0x1245   :  { %v3512_v56 = vsel %vm170_vm7, %v3508_v8, 0.0 }
0x1246   :  { %v3509_v7 = vsel %vm170_vm7, %v3507_v6, 0.0 }
0x1247   :  { %3510 = vadd.xlane.f32.xlu0 %v3509_v7 }
0x124b   :  { %3513 = vadd.xlane.f32.xlu0 %v3512_v56 }
0x12d4   :  { %v3511_v28 = vpop.xlane.xlu0 %3510 }
0x12d5   :  { %v3515_v29 = vmul.f32 0.03125, %v3511_v28 }
0x12d7   :  { %v3517_v30 = vadd.f32 1e-05, %v3515_v29 }
0x12d8   :  { %v3514_v31 = vpop.xlane.xlu0 %3513 }
0x12d9   :  { %4660 = vrsqrt.f32 %v3517_v30  ;;  %v3516_v32 = vmul.f32 0.03125, %v3514_v31 }
0x12db   :  { %v3518_v33 = vadd.f32 1e-05, %v3516_v32 }
0x12dd   :  { %4662 = vrsqrt.f32 %v3518_v33  ;;  %v4017_v33 = vld [vmem:[#allocation4 + $0xe] ss:$0 sm:$0xff] }
0x12e3   :  { %v4661_v34 = vpop.eup %4660 }
0x12e4   :  { %v3521_v38 = vmul.f32 %v4661_v34, %v3505_v5 }
0x12e6   :  { %v3527_v0 = vmul.f32 %v4009_v37, %v3521_v38 }
0x12e7   :  { %v4663_v40 = vpop.eup %4662 }
0x12e8   :  { %v3522_v41 = vmul.f32 %v4663_v40, %v3506_v44  ;;  %v3533_v42 = vadd.f32 %v4010_v48, %v3527_v0 }
0x12ea   :  { %v3528_v43 = vmul.f32 %v4009_v37, %v3522_v41  ;;  %4425 = vmatprep.mubr.msk.f32.mxu0 %vm170_vm7, %v3533_v42  ;;  %v4018_v41 = vld [vmem:[#allocation4 + $0xf] ss:$0 sm:$0xff] }
0x12ec   :  { %v3534_v45 = vadd.f32 %v4010_v48, %v3528_v43 }
0x12ee   :  { %4426 = vmatmul.mubr.msk.f32.vlgmr.msra.gmra.mrb[38].mxu0 %vm170_vm7, %v3534_v45 }
0x12ef   :  { %4561 = vmatpush3.bf16.msra.mxu0 %v4558_v26 }
0x13c1   :  { %v4427_v53 = vpop.f32.mrb[38].mxu0 }
0x13c2   :  { %v3622_v58 = vadd.f32 %v4427_v53, %v4011_v52  ;;  %v3616_v59 = vpop.f32.mrb[39].mxu0 }
0x13c3   :  { %v3617_v60 = vadd.f32 %v4011_v52, %v3616_v59 }
0x13c4   :  { %v3626_v1 = vmax.f32 %v3622_v58, 0.0 }
0x13c5   :  { %v3625_v63 = vmax.f32 %v3617_v60, 0.0 }
0x13c7   :  { %4444 = vmatprep.mubr.msk.f32.mxu1 %vm1841_vm12, %v3625_v63 }
0x13c8   :  { %4445 = vmatmul.mubr.msk.f32.vlgmr.msra.gmra.mrb[40].mxu1 %vm1841_vm12, %v3626_v1 }
0x149b   :  { %v4446_v44 = vpop.f32.mrb[40].mxu1 }
0x149c   :  { %v3718_v5 = vadd.f32 %v4446_v44, %v4014_v3  ;;  %v3712_v6 = vpop.f32.mrb[41].mxu1 }
0x149d   :  { %v3713_v7 = vadd.f32 %v4014_v3, %v3712_v6 }
0x149e   :  { %v3722_v8 = vadd.f32 %v3718_v5, %v3534_v45 }
0x149f   :  { %v3721_v56 = vadd.f32 %v3713_v7, %v3533_v42 }
0x14a0   :  { %v3728_v55 = vsel %vm170_vm7, %v3722_v8, 0.0 }
0x14a1   :  { %3729 = vadd.xlane.f32.xlu0 %v3728_v55  ;;  %v3725_v10 = vsel %vm170_vm7, %v3721_v56, 0.0  ;;  %v4019_v55 = vld [vmem:[#allocation4 + $0x10] ss:$0 sm:$0xff] }
0x14a2   :  { %3726 = vadd.xlane.f32.xlu1 %v3725_v10 }
0x152e   :  { %v3730_v11 = vpop.xlane.xlu0 %3729 }
0x152f   :  { %v3732_v12 = vmul.f32 0.03125, %v3730_v11  ;;  %v3727_v14 = vpop.xlane.xlu1 %3726 }
0x1530   :  { %v3731_v15 = vmul.f32 0.03125, %v3727_v14 }
0x1531   :  { %v5244_v16 = vsub.f32 %v3722_v8, %v3732_v12 }
0x1532   :  { %v5246_v24 = vsub.f32 %v3721_v56, %v3731_v15 }
0x1533   :  { %v3736_v19 = vmul.f32 %v5244_v16, %v5244_v16 }
0x1534   :  { %v3735_v20 = vmul.f32 %v5246_v24, %v5246_v24 }
0x1535   :  { %v3740_v21 = vsel %vm170_vm7, %v3736_v19, 0.0 }
0x1536   :  { %3741 = vadd.xlane.f32.xlu0 %v3740_v21  ;;  %v3737_v25 = vsel %vm170_vm7, %v3735_v20, 0.0 }
0x1537   :  { %3738 = vadd.xlane.f32.xlu1 %v3737_v25 }
0x1548   :  { %3855 = vrot.lane.b32.xlu1 %v4952_v9, %s4718_s26  ;;  %v3765_v9 = vld [vmem:[#allocation2 + $0x1a0] sm:$0xff]  ;;  %s4734_s26 = smov 72  }
0x154c   :  { %3858 = vrot.lane.b32.xlu0 %v4958_v13, %s4728_s21  ;;  %3861 = vrot.lane.b32.xlu1 %v4965_v17, %s4729_s22  ;;  %v3766_v13 = vld [vmem:[#allocation2 + $0x1a8] sm:$0xff] }
0x154d   :  { %v4562_v17 = vpack.c.bf16 %v3766_v13, %v3765_v9 }
0x154f   :  { %4563 = vmatprep.subr.bf16.mxu0 %v4562_v17 }
0x1550   :  { %3867 = vrot.lane.b32.xlu0 %v4974_v22, %s4730_s23  ;;  %3864 = vrot.lane.b32.xlu1 %v4968_v18, %s4731_s24 }
0x1551   :  { %4565 = vmatpush3.bf16.msra.mxu0 %v4562_v17 }
0x1554   :  { %3873 = vrot.lane.b32.xlu0 %v4988_v27, %s4732_s25  ;;  %3870 = vrot.lane.b32.xlu1 %v4978_v23, %s4733_s27 }
0x1558   :  { %3879 = vrot.lane.b32.xlu0 %v5178_v50, %s4734_s26  ;;  %3876 = vrot.lane.b32.xlu1 %v5169_v39, %s4727_s20 }
0x155c   :  { %3885 = vrot.lane.b32.xlu0 %v5186_v54, %s4735_s28  ;;  %3882 = vrot.lane.b32.xlu1 %v5176_v49, %s4736_s29 }
0x1560   :  { %3891 = vrot.lane.b32.xlu0 %v5198_v61, %s4723_s0  ;;  %3888 = vrot.lane.b32.xlu1 %v5191_v57, %s4726_s19 }
0x1564   :  { %3897 = vrot.lane.b32.xlu0 %v5212_v2, %s4724_s2  ;;  %3894 = vrot.lane.b32.xlu1 %v5202_v62, %s4725_s18 }
0x15c3   :  { %v3742_v18 = vpop.xlane.xlu0 %3741 }
0x15c4   :  { %v3744_v22 = vmul.f32 0.03125, %v3742_v18  ;;  %v3739_v23 = vpop.xlane.xlu1 %3738 }
0x15c5   :  { %v3743_v27 = vmul.f32 0.03125, %v3739_v23 }
0x15c6   :  { %v3746_v39 = vadd.f32 1e-05, %v3744_v22 }
0x15c7   :  { %v3745_v50 = vadd.f32 1e-05, %v3743_v27  ;;  %v3859_v54 = vpop.permute.xlu0 %3858 }
0x15c8   :  { %4664 = vrsqrt.f32 %v3746_v39  ;;  %v3856_v49 = vpop.permute.xlu1 %3855 }
0x15c9   :  { %4666 = vrsqrt.f32 %v3745_v50  ;;  %v3900_v57 = vsel %vm268_vm9, %v4945_v4, %v3856_v49 }
0x15ca   :  { %v3901_v2 = vsel %vm1597_vm10, %v3900_v57, %v3859_v54 }
0x15cb   :  { %v3868_v61 = vpop.permute.xlu0 %3867 }
0x15cc   :  { %v3862_v28 = vpop.permute.xlu1 %3861 }
0x15cd   :  { %v3902_v62 = vsel %vm1600_vm11, %v3901_v2, %v3862_v28 }
0x15cf   :  { %v3874_v29 = vpop.permute.xlu0 %3873 }
0x15d0   :  { %v3865_v30 = vpop.permute.xlu1 %3864 }
0x15d1   :  { %v3903_v31 = vsel %vm170_vm7, %v3902_v62, %v3865_v30 }
0x15d2   :  { %v4665_v32 = vpop.eup %4664  ;;  %v3905_v48 = vsel %vm3904_vm13, %v3903_v31, %v3868_v61 }
0x15d3   :  { %v4667_v34 = vpop.eup %4666  ;;  %v3750_v37 = vmul.f32 %v4665_v32, %v5244_v16  ;;  %v3880_v38 = vpop.permute.xlu0 %3879 }
0x15d4   :  { %v3871_v0 = vpop.permute.xlu1 %3870  ;;  %v3749_v4 = vmul.f32 %v4667_v34, %v5246_v24 }
0x15d5   :  { %v3907_v40 = vsel %vm3906_vm14, %v3905_v48, %v3871_v0  ;;  %v3756_v42 = vmul.f32 %v4017_v33, %v3750_v37 }
0x15d6   :  { %v3755_v43 = vmul.f32 %v4017_v33, %v3749_v4  ;;  %v3909_v45 = vsel %vm3908_vm15, %v3907_v40, %v3874_v29 }
0x15d7   :  { %v3886_v51 = vpop.permute.xlu0 %3885  ;;  %v3762_v53 = vadd.f32 %v4018_v41, %v3756_v42 }
0x15d8   :  { %v3877_v46 = vpop.permute.xlu1 %3876  ;;  %v3761_v47 = vadd.f32 %v4018_v41, %v3755_v43 }
0x15d9   :  { %v3910_v52 = vsel %vm1841_vm12, %v3909_v45, %v3877_v46 }
0x15da   :  { %4455 = vmatprep.mubr.msk.f32.mxu0 %vm170_vm7, %v3761_v47  ;;  %v3912_v58 = vsel %vm3911_vm0, %v3910_v52, %v3880_v38 }
0x15db   :  { %4456 = vmatmul.mubr.msk.f32.vlgmr.msra.gmra.mrb[40].mxu0 %vm170_vm7, %v3762_v53  ;;  %v3892_v63 = vpop.permute.xlu0 %3891 }
0x15dc   :  { %v3883_v59 = vpop.permute.xlu1 %3882 }
0x15dd   :  { %v3913_v60 = vsel %vm79_vm2, %v3912_v58, %v3883_v59 }
0x15de   :  { %v3915_v1 = vsel %vm3914_vm1, %v3913_v60, %v3886_v51 }
0x15df   :  { %v3898_v7 = vpop.permute.xlu0 %3897 }
0x15e0   :  { %v3889_v3 = vpop.permute.xlu1 %3888 }
0x15e1   :  { %v3917_v44 = vsel %vm3916_vm3, %v3915_v1, %v3889_v3 }
0x15e2   :  { %v3919_v5 = vsel %vm3918_vm4, %v3917_v44, %v3892_v63 }
0x15e4   :  { %v3895_v6 = vpop.permute.xlu1 %3894 }
0x15e5   :  { %v3921_v8 = vsel %vm3920_vm5, %v3919_v5, %v3895_v6 }
0x15e6   :  { %v3923_v56 = vsel %vm3922_vm6, %v3921_v8, %v3898_v7 }
0x15e7   :  { %3924 = vst [vmem:[%s5301_s4] sm:$0xff] %v3923_v56 }
0x16ae   :  { %v4457_v10 = vpop.f32.mrb[40].mxu0 }
0x16af   :  { %v3850_v11 = vadd.f32 %v4457_v10, %v4019_v55  ;;  %v3844_v12 = vpop.f32.mrb[41].mxu0 }
0x16b0   :  { %v3845_v14 = vadd.f32 %v4019_v55, %v3844_v12 }
0x16b1   :  { %3854 = vst [vmem:[%s5300_s3 + $0x8] sm:$0xff] %v3850_v11 }
0x16b2   :  { %3853 = vst [vmem:[%s5300_s3] sm:$0xff] %v3845_v14 }
0x16b3   :  { %3933 = vsyncpa [#allocation3], 1 }
0x16b4   :  { %3934 = vsyncpa [#allocation5], 1 }

</bundles_post_ra>
